<compile_context>
chip_gen: v7x
topology: tpu7x:2x2x1
jax: 0.10.0
libtpu: 0.0.40
codegen_flags: <defaults>
</compile_context>

<pallas_src>
import jax
import jax.numpy as jnp
from jax.experimental import pallas as pl
from jax.experimental.pallas import tpu as pltpu

LANE = 128


def _round_up(x, m):
    return ((x + m - 1) // m) * m


def net_kernel(hl_ref, rl_ref, tl_ref,
               h_ref, r_ref, t_ref, hn_ref, rn_ref, tn_ref,
               out_ref):
    hl = hl_ref[...]          # [D+1, Vh_pad]  tanh'd entity table + norm row
    rl = rl_ref[...]          # [D+1, Vr_pad]  tanh'd relation table + norm row
    tl = tl_ref[...]          # [D+1, Vh_pad]  tanh'd entity table + norm row

    d = hl.shape[0] - 1       # embedding dim; row d holds precomputed norms
    tile_b = h_ref.shape[-1]

    # Only int32 intermediates; hoisted once per grid step.
    iota_v = jax.lax.broadcasted_iota(jnp.int32, (hl.shape[1], tile_b), 0)
    iota_r = jax.lax.broadcasted_iota(jnp.int32, (rl.shape[1], tile_b), 0)

    def gather(table_t, iota, idx_ref):
        # Exact fused embedding lookup: table_t [D+1, V_pad] @ onehot [V_pad, TILE_B].
        onehot = (iota == idx_ref[...]).astype(table_t.dtype)
        return jnp.dot(table_t, onehot,
                       preferred_element_type=jnp.float32,
                       precision=jax.lax.Precision.HIGHEST)

    def score(hg, rg, tg):
        # Rows [0:d] are tanh'd embeddings, row d is the precomputed L2 norm.
        h, t, r = hg[:d, :], tg[:d, :], rg[:d, :]
        norms = hg[d:, :] + rg[d:, :] + tg[d:, :]                # (1, TILE_B)
        s = jnp.sum(h * t + r * (t - h), axis=0, keepdims=True)  # fused ht + rth
        return norms - 2.0 * s

    # Positive triple first (store it before the negative gathers are issued
    # to bound live [D+1, TILE_B] intermediates / vreg spills).
    hg = gather(hl, iota_v, h_ref)
    rg = gather(rl, iota_r, r_ref)
    tg = gather(tl, iota_v, t_ref)
    out_ref[0:1, :] = score(hg, rg, tg)

    hg = gather(hl, iota_v, hn_ref)
    rg = gather(rl, iota_r, rn_ref)
    tg = gather(tl, iota_v, tn_ref)
    out_ref[1:2, :] = score(hg, rg, tg)


def net_forward(params, x, x_, *, tile_b=2048):
    """params = (hl, rl, tl) embedding tables; x, x_ = (h, r, t) index triples."""
    hl, rl, tl = params

    h_idx, r_idx, t_idx = x
    hn_idx, rn_idx, tn_idx = x_
    idx_list = [h_idx, r_idx, t_idx, hn_idx, rn_idx, tn_idx]
    batch = int(h_idx.shape[0])

    # Batch lives on the lane axis: pad it to a multiple of the lane tile.
    b_lane = _round_up(batch, LANE)
    tile_b = _round_up(max(LANE, min(int(tile_b), b_lane)), LANE)
    if b_lane >= 2 * LANE:
        # Keep >=2 (targeting ~8) grid steps so both v7x TensorCores get work
        # and the index/output DMA pipeline has something to overlap.
        tile_b = min(tile_b, max(LANE, _round_up(b_lane // 8, LANE)))
    b_pad = _round_up(batch, tile_b)

    def prep_idx(i):
        i = jnp.asarray(i, jnp.int32)
        return jnp.pad(i, (0, b_pad - batch)).reshape(1, b_pad)

    idx_in = [prep_idx(i) for i in idx_list]

    def prep_table(tab):
        # Bake tanh into the table and append the per-row L2 norm of the
        # activated embedding as an extra feature row (gathered for free).
        tab = jnp.tanh(tab.astype(jnp.float32))                       # [V, D]
        norms = jnp.sqrt(jnp.sum(tab * tab, axis=1, keepdims=True))   # [V, 1]
        aug = jnp.concatenate([tab, norms], axis=1)                   # [V, D+1]
        v = aug.shape[0]
        v_pad = _round_up(v, 8)
        aug = jnp.pad(aug, ((0, v_pad - v), (0, 0)))
        return aug.T                                                  # [D+1, V_pad]

    hl_t, rl_t, tl_t = prep_table(hl), prep_table(rl), prep_table(tl)

    grid = (b_pad // tile_b,)
    table_specs = [pl.BlockSpec(tab.shape, lambda i: (0, 0))
                   for tab in (hl_t, rl_t, tl_t)]   # whole table resident in VMEM
    idx_spec = pl.BlockSpec((1, tile_b), lambda i: (0, i))
    out_spec = pl.BlockSpec((2, tile_b), lambda i: (0, i))

    out = pl.pallas_call(
        net_kernel,
        out_shape=jax.ShapeDtypeStruct((2, b_pad), jnp.float32),
        grid=grid,
        in_specs=table_specs + [idx_spec] * 6,
        out_specs=out_spec,
        compiler_params=pltpu.CompilerParams(
            dimension_semantics=("parallel",),
            vmem_limit_bytes=32 * 1024 * 1024,   # safe on v5e/v6e and v7x (64 MiB phys)
        ),
    )(hl_t, rl_t, tl_t, *idx_in)

    return out[0, :batch], out[1, :batch]


def _reference(params, x, x_):
    """Pure-JAX reference mirroring the PyTorch forward."""
    hl, rl, tl = params
    act = jnp.tanh

    def dist(hi, ri, ti):
        h = act(jnp.take(hl, hi, axis=0))
        r = act(jnp.take(rl, ri, axis=0))
        t = act(jnp.take(tl, ti, axis=0))
        norms = (jnp.sqrt(jnp.sum(h * h, axis=1)) +
                 jnp.sqrt(jnp.sum(r * r, axis=1)) +
                 jnp.sqrt(jnp.sum(t * t, axis=1)))
        ht = jnp.sum(h * t, axis=1)
        rth = jnp.sum(r * (t - h), axis=1)
        return norms - 2.0 * (ht + rth)

    return dist(*x), dist(*x_)


if __name__ == "__main__":
    dim = 32
    vocab_dim = 50
    relation_dim = 10
    B = 8

    key = jax.random.PRNGKey(0)
    k_hl, k_rl, k_tl, k_idx = jax.random.split(key, 4)

    # Deterministic parameter init (nn.Embedding default ~ N(0, 1)).
    hl = jax.random.normal(k_hl, (vocab_dim, dim), dtype=jnp.float32)
    rl = jax.random.normal(k_rl, (relation_dim, dim), dtype=jnp.float32)
    tl = jax.random.normal(k_tl, (vocab_dim, dim), dtype=jnp.float32)
    params = (hl, rl, tl)

    ks = jax.random.split(k_idx, 6)
    h = jax.random.randint(ks[0], (B,), 0, vocab_dim, dtype=jnp.int32)
    r = jax.random.randint(ks[1], (B,), 0, relation_dim, dtype=jnp.int32)
    t = jax.random.randint(ks[2], (B,), 0, vocab_dim, dtype=jnp.int32)
    h_ = jax.random.randint(ks[3], (B,), 0, vocab_dim, dtype=jnp.int32)
    r_ = jax.random.randint(ks[4], (B,), 0, relation_dim, dtype=jnp.int32)
    t_ = jax.random.randint(ks[5], (B,), 0, vocab_dim, dtype=jnp.int32)

    pos, neg = net_forward(params, (h, r, t), (h_, r_, t_))
    jax.block_until_ready((pos, neg))

    ref_pos, ref_neg = _reference(params, (h, r, t), (h_, r_, t_))
    assert pos.shape == ref_pos.shape and neg.shape == ref_neg.shape
    assert jnp.allclose(pos, ref_pos, atol=1e-3, rtol=1e-3), (pos, ref_pos)
    assert jnp.allclose(neg, ref_neg, atol=1e-3, rtol=1e-3), (neg, ref_neg)

    print("KERNEL_OK")
</pallas_src>

<mosaic_0001>
module attributes {stable_mosaic.version = 11 : i64} {
  func.func @net_kernel(%arg0: i32, %arg1: memref<33x56xf32, #tpu.memory_space<vmem>>, %arg2: memref<33x16xf32, #tpu.memory_space<vmem>>, %arg3: memref<33x56xf32, #tpu.memory_space<vmem>>, %arg4: memref<1x128xi32, #tpu.memory_space<vmem>>, %arg5: memref<1x128xi32, #tpu.memory_space<vmem>>, %arg6: memref<1x128xi32, #tpu.memory_space<vmem>>, %arg7: memref<1x128xi32, #tpu.memory_space<vmem>>, %arg8: memref<1x128xi32, #tpu.memory_space<vmem>>, %arg9: memref<1x128xi32, #tpu.memory_space<vmem>>, %arg10: memref<2x128xf32, #tpu.memory_space<vmem>>) attributes {dimension_semantics = [#tpu.dimension_semantics<parallel>], iteration_bounds = array<i64: 1>, scalar_prefetch = 0 : i64, scratch_operands = 0 : i64, tpu.core_type = #tpu.core_type<tc>, window_params = [{pipeline_mode = #tpu.pipeline_mode<synchronous>, transform_indices = @transform_0, window_bounds = array<i64: 33, 56>}, {pipeline_mode = #tpu.pipeline_mode<synchronous>, transform_indices = @transform_1, window_bounds = array<i64: 33, 16>}, {pipeline_mode = #tpu.pipeline_mode<synchronous>, transform_indices = @transform_2, window_bounds = array<i64: 33, 56>}, {transform_indices = @transform_3, window_bounds = array<i64: 1, 128>}, {transform_indices = @transform_4, window_bounds = array<i64: 1, 128>}, {transform_indices = @transform_5, window_bounds = array<i64: 1, 128>}, {transform_indices = @transform_6, window_bounds = array<i64: 1, 128>}, {transform_indices = @transform_7, window_bounds = array<i64: 1, 128>}, {transform_indices = @transform_8, window_bounds = array<i64: 1, 128>}, {transform_indices = @transform_9, window_bounds = array<i64: 2, 128>}]} {
    %c0 = arith.constant 0 : index
    %c0_0 = arith.constant 0 : index
    %0 = vector.load %arg1[%c0, %c0_0] : memref<33x56xf32, #tpu.memory_space<vmem>>, vector<33x56xf32>
    %c0_1 = arith.constant 0 : index
    %c0_2 = arith.constant 0 : index
    %1 = vector.load %arg2[%c0_1, %c0_2] : memref<33x16xf32, #tpu.memory_space<vmem>>, vector<33x16xf32>
    %c0_3 = arith.constant 0 : index
    %c0_4 = arith.constant 0 : index
    %2 = vector.load %arg3[%c0_3, %c0_4] : memref<33x56xf32, #tpu.memory_space<vmem>>, vector<33x56xf32>
    %3 = tpu.iota {dimensions = array<i32: 0>} : vector<56x128xi32>
    %4 = tpu.iota {dimensions = array<i32: 0>} : vector<16x128xi32>
    %c0_5 = arith.constant 0 : index
    %c0_6 = arith.constant 0 : index
    %5 = vector.load %arg4[%c0_5, %c0_6] : memref<1x128xi32, #tpu.memory_space<vmem>>, vector<1x128xi32>
    %6 = vector.broadcast %5 : vector<1x128xi32> to vector<56x128xi32>
    %7 = arith.cmpi eq, %3, %6 : vector<56x128xi32>
    %8 = arith.extui %7 : vector<56x128xi1> to vector<56x128xi32>
    %9 = arith.sitofp %8 : vector<56x128xi32> to vector<56x128xf32>
    %cst = arith.constant dense<0.000000e+00> : vector<33x128xf32>
    %10 = tpu.matmul %0, %9, %cst {dimension_numbers = #tpu.dot_dimension_numbers<[1], [0], [0], [1], [0, 0, 1, 1], [], []>, precision = #tpu.contract_precision<fp32>} : vector<33x56xf32>, vector<56x128xf32>, vector<33x128xf32> -> vector<33x128xf32>
    %c0_7 = arith.constant 0 : index
    %c0_8 = arith.constant 0 : index
    %11 = vector.load %arg5[%c0_7, %c0_8] : memref<1x128xi32, #tpu.memory_space<vmem>>, vector<1x128xi32>
    %12 = vector.broadcast %11 : vector<1x128xi32> to vector<16x128xi32>
    %13 = arith.cmpi eq, %4, %12 : vector<16x128xi32>
    %14 = arith.extui %13 : vector<16x128xi1> to vector<16x128xi32>
    %15 = arith.sitofp %14 : vector<16x128xi32> to vector<16x128xf32>
    %cst_9 = arith.constant dense<0.000000e+00> : vector<33x128xf32>
    %16 = tpu.matmul %1, %15, %cst_9 {dimension_numbers = #tpu.dot_dimension_numbers<[1], [0], [0], [1], [0, 0, 1, 1], [], []>, precision = #tpu.contract_precision<fp32>} : vector<33x16xf32>, vector<16x128xf32>, vector<33x128xf32> -> vector<33x128xf32>
    %c0_10 = arith.constant 0 : index
    %c0_11 = arith.constant 0 : index
    %17 = vector.load %arg6[%c0_10, %c0_11] : memref<1x128xi32, #tpu.memory_space<vmem>>, vector<1x128xi32>
    %18 = vector.broadcast %17 : vector<1x128xi32> to vector<56x128xi32>
    %19 = arith.cmpi eq, %3, %18 : vector<56x128xi32>
    %20 = arith.extui %19 : vector<56x128xi1> to vector<56x128xi32>
    %21 = arith.sitofp %20 : vector<56x128xi32> to vector<56x128xf32>
    %cst_12 = arith.constant dense<0.000000e+00> : vector<33x128xf32>
    %22 = tpu.matmul %2, %21, %cst_12 {dimension_numbers = #tpu.dot_dimension_numbers<[1], [0], [0], [1], [0, 0, 1, 1], [], []>, precision = #tpu.contract_precision<fp32>} : vector<33x56xf32>, vector<56x128xf32>, vector<33x128xf32> -> vector<33x128xf32>
    %23 = vector.extract_strided_slice %10 {offsets = [0, 0], sizes = [32, 128], strides = [1, 1]} : vector<33x128xf32> to vector<32x128xf32>
    %24 = vector.extract_strided_slice %22 {offsets = [0, 0], sizes = [32, 128], strides = [1, 1]} : vector<33x128xf32> to vector<32x128xf32>
    %25 = vector.extract_strided_slice %16 {offsets = [0, 0], sizes = [32, 128], strides = [1, 1]} : vector<33x128xf32> to vector<32x128xf32>
    %26 = vector.extract_strided_slice %10 {offsets = [32, 0], sizes = [1, 128], strides = [1, 1]} : vector<33x128xf32> to vector<1x128xf32>
    %27 = vector.extract_strided_slice %16 {offsets = [32, 0], sizes = [1, 128], strides = [1, 1]} : vector<33x128xf32> to vector<1x128xf32>
    %28 = arith.addf %26, %27 : vector<1x128xf32>
    %29 = vector.extract_strided_slice %22 {offsets = [32, 0], sizes = [1, 128], strides = [1, 1]} : vector<33x128xf32> to vector<1x128xf32>
    %30 = arith.addf %28, %29 : vector<1x128xf32>
    %31 = arith.mulf %23, %24 : vector<32x128xf32>
    %32 = arith.subf %24, %23 : vector<32x128xf32>
    %33 = arith.mulf %25, %32 : vector<32x128xf32>
    %34 = arith.addf %31, %33 : vector<32x128xf32>
    %cst_13 = arith.constant dense<0.000000e+00> : vector<128xf32>
    %35 = vector.multi_reduction <add>, %34, %cst_13 [0] : vector<32x128xf32> to vector<128xf32>
    %36 = vector.shape_cast %35 : vector<128xf32> to vector<1x128xf32>
    %cst_14 = arith.constant 2.000000e+00 : f32
    %37 = vector.broadcast %cst_14 : f32 to vector<1x128xf32>
    %38 = arith.mulf %37, %36 : vector<1x128xf32>
    %39 = arith.subf %30, %38 : vector<1x128xf32>
    %c0_15 = arith.constant 0 : index
    %c0_16 = arith.constant 0 : index
    %40 = vector.load %arg10[%c0_15, %c0_16] : memref<2x128xf32, #tpu.memory_space<vmem>>, vector<1x128xf32>
    tpu.vector_store %arg10[%c0_15, %c0_16], %39 {strides = array<i32>} : memref<2x128xf32, #tpu.memory_space<vmem>>, vector<1x128xf32>,
    %c0_17 = arith.constant 0 : index
    %c0_18 = arith.constant 0 : index
    %41 = vector.load %arg7[%c0_17, %c0_18] : memref<1x128xi32, #tpu.memory_space<vmem>>, vector<1x128xi32>
    %42 = vector.broadcast %41 : vector<1x128xi32> to vector<56x128xi32>
    %43 = arith.cmpi eq, %3, %42 : vector<56x128xi32>
    %44 = arith.extui %43 : vector<56x128xi1> to vector<56x128xi32>
    %45 = arith.sitofp %44 : vector<56x128xi32> to vector<56x128xf32>
    %cst_19 = arith.constant dense<0.000000e+00> : vector<33x128xf32>
    %46 = tpu.matmul %0, %45, %cst_19 {dimension_numbers = #tpu.dot_dimension_numbers<[1], [0], [0], [1], [0, 0, 1, 1], [], []>, precision = #tpu.contract_precision<fp32>} : vector<33x56xf32>, vector<56x128xf32>, vector<33x128xf32> -> vector<33x128xf32>
    %c0_20 = arith.constant 0 : index
    %c0_21 = arith.constant 0 : index
    %47 = vector.load %arg8[%c0_20, %c0_21] : memref<1x128xi32, #tpu.memory_space<vmem>>, vector<1x128xi32>
    %48 = vector.broadcast %47 : vector<1x128xi32> to vector<16x128xi32>
    %49 = arith.cmpi eq, %4, %48 : vector<16x128xi32>
    %50 = arith.extui %49 : vector<16x128xi1> to vector<16x128xi32>
    %51 = arith.sitofp %50 : vector<16x128xi32> to vector<16x128xf32>
    %cst_22 = arith.constant dense<0.000000e+00> : vector<33x128xf32>
    %52 = tpu.matmul %1, %51, %cst_22 {dimension_numbers = #tpu.dot_dimension_numbers<[1], [0], [0], [1], [0, 0, 1, 1], [], []>, precision = #tpu.contract_precision<fp32>} : vector<33x16xf32>, vector<16x128xf32>, vector<33x128xf32> -> vector<33x128xf32>
    %c0_23 = arith.constant 0 : index
    %c0_24 = arith.constant 0 : index
    %53 = vector.load %arg9[%c0_23, %c0_24] : memref<1x128xi32, #tpu.memory_space<vmem>>, vector<1x128xi32>
    %54 = vector.broadcast %53 : vector<1x128xi32> to vector<56x128xi32>
    %55 = arith.cmpi eq, %3, %54 : vector<56x128xi32>
    %56 = arith.extui %55 : vector<56x128xi1> to vector<56x128xi32>
    %57 = arith.sitofp %56 : vector<56x128xi32> to vector<56x128xf32>
    %cst_25 = arith.constant dense<0.000000e+00> : vector<33x128xf32>
    %58 = tpu.matmul %2, %57, %cst_25 {dimension_numbers = #tpu.dot_dimension_numbers<[1], [0], [0], [1], [0, 0, 1, 1], [], []>, precision = #tpu.contract_precision<fp32>} : vector<33x56xf32>, vector<56x128xf32>, vector<33x128xf32> -> vector<33x128xf32>
    %59 = vector.extract_strided_slice %46 {offsets = [0, 0], sizes = [32, 128], strides = [1, 1]} : vector<33x128xf32> to vector<32x128xf32>
    %60 = vector.extract_strided_slice %58 {offsets = [0, 0], sizes = [32, 128], strides = [1, 1]} : vector<33x128xf32> to vector<32x128xf32>
    %61 = vector.extract_strided_slice %52 {offsets = [0, 0], sizes = [32, 128], strides = [1, 1]} : vector<33x128xf32> to vector<32x128xf32>
    %62 = vector.extract_strided_slice %46 {offsets = [32, 0], sizes = [1, 128], strides = [1, 1]} : vector<33x128xf32> to vector<1x128xf32>
    %63 = vector.extract_strided_slice %52 {offsets = [32, 0], sizes = [1, 128], strides = [1, 1]} : vector<33x128xf32> to vector<1x128xf32>
    %64 = arith.addf %62, %63 : vector<1x128xf32>
    %65 = vector.extract_strided_slice %58 {offsets = [32, 0], sizes = [1, 128], strides = [1, 1]} : vector<33x128xf32> to vector<1x128xf32>
    %66 = arith.addf %64, %65 : vector<1x128xf32>
    %67 = arith.mulf %59, %60 : vector<32x128xf32>
    %68 = arith.subf %60, %59 : vector<32x128xf32>
    %69 = arith.mulf %61, %68 : vector<32x128xf32>
    %70 = arith.addf %67, %69 : vector<32x128xf32>
    %cst_26 = arith.constant dense<0.000000e+00> : vector<128xf32>
    %71 = vector.multi_reduction <add>, %70, %cst_26 [0] : vector<32x128xf32> to vector<128xf32>
    %72 = vector.shape_cast %71 : vector<128xf32> to vector<1x128xf32>
    %cst_27 = arith.constant 2.000000e+00 : f32
    %73 = vector.broadcast %cst_27 : f32 to vector<1x128xf32>
    %74 = arith.mulf %73, %72 : vector<1x128xf32>
    %75 = arith.subf %66, %74 : vector<1x128xf32>
    %c1 = arith.constant 1 : index
    %c0_28 = arith.constant 0 : index
    %76 = vector.load %arg10[%c1, %c0_28] : memref<2x128xf32, #tpu.memory_space<vmem>>, vector<1x128xf32>
    tpu.vector_store %arg10[%c1, %c0_28], %75 {strides = array<i32>} : memref<2x128xf32, #tpu.memory_space<vmem>>, vector<1x128xf32>,
    return
  }
  func.func @transform_0(%arg0: i32) -> (i32, i32) {
    %c0_i32 = arith.constant 0 : i32
    %c0_i32_0 = arith.constant 0 : i32
    %c0_i32_1 = arith.constant 0 : i32
    return %c0_i32, %c0_i32_0 : i32, i32
  }
  func.func @transform_1(%arg0: i32) -> (i32, i32) {
    %c0_i32 = arith.constant 0 : i32
    %c0_i32_0 = arith.constant 0 : i32
    %c0_i32_1 = arith.constant 0 : i32
    return %c0_i32, %c0_i32_0 : i32, i32
  }
  func.func @transform_2(%arg0: i32) -> (i32, i32) {
    %c0_i32 = arith.constant 0 : i32
    %c0_i32_0 = arith.constant 0 : i32
    %c0_i32_1 = arith.constant 0 : i32
    return %c0_i32, %c0_i32_0 : i32, i32
  }
  func.func @transform_3(%arg0: i32) -> (i32, i32) {
    %c0_i32 = arith.constant 0 : i32
    %c0_i32_0 = arith.constant 0 : i32
    return %c0_i32, %arg0 : i32, i32
  }
  func.func @transform_4(%arg0: i32) -> (i32, i32) {
    %c0_i32 = arith.constant 0 : i32
    %c0_i32_0 = arith.constant 0 : i32
    return %c0_i32, %arg0 : i32, i32
  }
  func.func @transform_5(%arg0: i32) -> (i32, i32) {
    %c0_i32 = arith.constant 0 : i32
    %c0_i32_0 = arith.constant 0 : i32
    return %c0_i32, %arg0 : i32, i32
  }
  func.func @transform_6(%arg0: i32) -> (i32, i32) {
    %c0_i32 = arith.constant 0 : i32
    %c0_i32_0 = arith.constant 0 : i32
    return %c0_i32, %arg0 : i32, i32
  }
  func.func @transform_7(%arg0: i32) -> (i32, i32) {
    %c0_i32 = arith.constant 0 : i32
    %c0_i32_0 = arith.constant 0 : i32
    return %c0_i32, %arg0 : i32, i32
  }
  func.func @transform_8(%arg0: i32) -> (i32, i32) {
    %c0_i32 = arith.constant 0 : i32
    %c0_i32_0 = arith.constant 0 : i32
    return %c0_i32, %arg0 : i32, i32
  }
  func.func @transform_9(%arg0: i32) -> (i32, i32) {
    %c0_i32 = arith.constant 0 : i32
    %c0_i32_0 = arith.constant 0 : i32
    return %c0_i32, %arg0 : i32, i32
  }
}

</mosaic_0001>

<bundles_post_ra>
// kernel: tpu_custom_call.1
= control target key start
LH: loop header
LB: loop body
LE: loop exit
PB: predicated region body
PF: predicated region fallthrough
CT: control target
= control target key end

     0   :  { %14 = vsyncpa [#allocation3], 0  ;;  %s8165_s0 = inlined_call_operand.vmem [shape: f32[33,56], index: 0, kind: input, shape index: {}]   ;;  %s8166_s1 = inlined_call_operand.vmem [shape: f32[33,16], index: 1, kind: input, shape index: {}]   ;;  %s8167_s2 = inlined_call_operand.hbm [shape: f32[33,56], index: 2, kind: input, shape index: {}]   ;;  %s8168_s3 = inlined_call_operand.vmem [shape: s32[1,128], index: 3, kind: input, shape index: {}]   ;;  %s8169_s4 = inlined_call_operand.vmem [shape: s32[1,128], index: 4, kind: input, shape index: {}]   ;;  %s8170_s5 = inlined_call_operand.vmem [shape: s32[1,128], index: 5, kind: input, shape index: {}]   ;;  %s8171_s6 = inlined_call_operand.vmem [shape: s32[1,128], index: 6, kind: input, shape index: {}]   ;;  %s8172_s7 = inlined_call_operand.vmem [shape: s32[1,128], index: 7, kind: input, shape index: {}]   ;;  %s8173_s8 = inlined_call_operand.vmem [shape: s32[1,128], index: 8, kind: input, shape index: {}]   ;;  %s8174_s9 = inlined_call_operand.hbm [shape: f32[2,128], index: 9, kind: output, shape index: {}]  }
   0x1   :  { %15 = vsyncpa [#allocation4], 0  ;;  %s6411_s30 = smov [#allocation2]   ;;  %s6363_s13 = scalar_lea.hbm %s8167_s2, 640 }
   0x2   :  { %s25_s10 = sshll.u32 %s6411_s30, 4  ;;  %p6364_p0 = scmp.ne.s32.totalorder %s8167_s2, %s6363_s13  ;;  %s26_s10 = int_to_ptr.vmem [resolvable:$true] %s25_s10 }
   0x3   :  { %p6367_p1 = scmp.lt.u32.totalorder %s6363_s13, %s8167_s2 }
   0x5   :  { %p6369_p2 = pnand %p6367_p1, %p6364_p0 }
   0x7   :  { %6372 = shalt.err (!%p6369_p2)
}
   0x8   :  { %s6373_s18 = scalar_lea.vmem %s26_s10, 640  ;;  %p6378_p4 = scmp.lt.s32.totalorder %s26_s10, %s26_s10 }
   0x9   :  { %p6374_p3 = scmp.ne.s32.totalorder %s26_s10, %s6373_s18  ;;  %p6379_p5 = scmp.lt.s32.totalorder %s6373_s18, %s6373_s18 }
   0xb   :  { %p6380_p6 = por %p6379_p5, %p6378_p4 }
   0xd   :  { %p6381_p7 = pnand %p6380_p6, %p6374_p3 }
   0xf   :  { %6384 = shalt.err (!%p6381_p7)
}
  0x10   :  { %s6412_s19 = smov 128   ;;  %s6413_s20 = smov 8  }
  0x11   :  { %31 = dma.hbm_to_vmem [thread:$0]  %s8167_s2, 640, %s26_s10, [#allocation3], %s6412_s19, %s6412_s19, %s6413_s20  }
  0x12   :  { %6407 = dma.done.wait [#allocation3], 640  }
  0x13   :  { %6408 = vsyncadd [#allocation3], 4294966656  ;;  %v62_v0 = vlaneseq  ;;  %v8189_v1 = vmov 0.0|0.0   ;;  %vm6415_vm0 = vmmov 0   ;;  %v8193_v3 = vmov 0.0   ;;  %v47_v31 = vld [vmem:[%s8165_s0] sm:$0xff] }
  0x14   :  { %5794 = vmatprep.subr.bf16.mxu0 %v8189_v1  ;;  %5920 = vmatprep.subr.bf16.mxu1 %v8189_v1  ;;  %vm96_vm1 = vcmask 457728   ;;  %v6502_v7 = vld [vmem:[%s8168_s3] ss:$0 sm:$0xff]  ;;  %v8177_v16 = vmov 1.0|1.0   ;;  %v48_v62 = vld [vmem:[%s8165_s0 + $0x8] sm:$0xff] }
  0x15   :  { %v6484_v2 = vshrl.u32 %v62_v0, 7  ;;  %4884 = vmatprep.mubr.msk.f32.mxu0 %vm6415_vm0, %v8193_v3  ;;  %5346 = vmatprep.mubr.msk.f32.mxu1 %vm6415_vm0, %v8193_v3  ;;  %v6507_v8 = vld [vmem:[%s8171_s6] ss:$0 sm:$0xff]  ;;  %v98_v44 = vsel %vm96_vm1, %v47_v31, 0  ;;  %v53_v19 = vld [vmem:[%s8166_s1 + $0x8] sm:$0xff]  ;;  %v54_v52 = vld [vmem:[%s8166_s1 + $0x10] sm:$0xff] }
  0x16   :  { %v6663_v61 = vand.u32 4294901760, %v98_v44 }
  0x17   :  { %v6491_v4 = vadd.s32 8, %v6484_v2  ;;  %v6494_v5 = vadd.s32 16, %v6484_v2  ;;  %v6497_v6 = vadd.s32 24, %v6484_v2  ;;  %v6510_v9 = vadd.s32 32, %v6484_v2 }
  0x18   :  { %v6513_v10 = vadd.s32 40, %v6484_v2  ;;  %vm75_vm2 = vcmp.eq.s32.totalorder %v6484_v2, %v6502_v7  ;;  %vm2238_vm4 = vcmp.eq.s32.totalorder %v6484_v2, %v6507_v8  ;;  %v6557_v22 = vadd.s32 48, %v6484_v2 }
  0x19   :  { %vm76_vm3 = vcmp.eq.s32.totalorder %v6491_v4, %v6502_v7  ;;  %vm2239_vm5 = vcmp.eq.s32.totalorder %v6491_v4, %v6507_v8  ;;  %v4365_v11 = vsel %vm75_vm2, 1.0, %v8193_v3  ;;  %v4432_v14 = vsel %vm2238_vm4, 1.0, %v8193_v3 }
  0x1a   :  { %v4366_v12 = vsel %vm76_vm3, 1.0, %v8193_v3  ;;  %vm6525_vm6 = vmpackc.low %vm76_vm3, %vm75_vm2  ;;  %v4433_v15 = vsel %vm2239_vm5, 1.0, %v8193_v3  ;;  %v6534_v17 = vsub.f32 %v4365_v11, %v4365_v11  ;;  %v6542_v20 = vsub.f32 %v4432_v14, %v4432_v14 }
  0x1b   :  { %5796 = vmatpush3.bf16.msk.msra.mxu0 %vm6525_vm6, %v8177_v16  ;;  %v6536_v18 = vsub.f32 %v4366_v12, %v4366_v12  ;;  %vm6538_vm7 = vmpackc.low %vm2239_vm5, %vm2238_vm4  ;;  %v6544_v21 = vsub.f32 %v4433_v15, %v4433_v15  ;;  %vm77_vm8 = vcmp.eq.s32.totalorder %v6494_v5, %v6502_v7  ;;  %vm78_vm9 = vcmp.eq.s32.totalorder %v6497_v6, %v6502_v7 }
  0x1c   :  { %5922 = vmatpush3.bf16.msk.msra.mxu1 %vm6538_vm7, %v8177_v16  ;;  %5797 = vmatprep.subr.bf16.mxu0 %v8189_v1  ;;  %vm2240_vm10 = vcmp.eq.s32.totalorder %v6494_v5, %v6507_v8  ;;  %v237_v23 = vand.u32 4294901760, %v6534_v17  ;;  %v2384_v25 = vand.u32 4294901760, %v6542_v20  ;;  %vm6564_vm11 = vmpackc.low %vm78_vm9, %vm77_vm8  ;;  %v4367_v28 = vsel %vm77_vm8, 1.0, %v8193_v3 }
  0x1d   :  { %v244_v24 = vand.u32 4294901760, %v6536_v18  ;;  %v2391_v26 = vand.u32 4294901760, %v6544_v21  ;;  %5923 = vmatprep.subr.bf16.mxu1 %v8189_v1  ;;  %v4368_v29 = vsel %vm78_vm9, 1.0, %v8193_v3  ;;  %vm2241_vm12 = vcmp.eq.s32.totalorder %v6497_v6, %v6507_v8 }
  0x1e   :  { %v4434_v30 = vsel %vm2240_vm10, 1.0, %v8193_v3  ;;  %v238_v32 = vsub.f32 %v6534_v17, %v237_v23  ;;  %v6588_v34 = vsub.f32 %v6542_v20, %v2384_v25  ;;  %vm6601_vm13 = vmpackc.low %vm2241_vm12, %vm2240_vm10  ;;  %v6605_v37 = vsub.f32 %v4367_v28, %v4367_v28 }
  0x1f   :  { %v245_v33 = vsub.f32 %v6536_v18, %v244_v24  ;;  %v6593_v35 = vsub.f32 %v6544_v21, %v2391_v26  ;;  %5799 = vmatpush3.bf16.msk.msra.mxu0 %vm6564_vm11, %v8177_v16  ;;  %v6607_v38 = vsub.f32 %v4368_v29, %v4368_v29  ;;  %v4435_v39 = vsel %vm2241_vm12, 1.0, %v8193_v3  ;;  %v49_v29 = vld [vmem:[%s8165_s0 + $0x10] sm:$0xff] }
  0x20   :  { %5925 = vmatpush3.bf16.msk.msra.mxu1 %vm6601_vm13, %v8177_v16  ;;  %v6613_v40 = vsub.f32 %v4434_v30, %v4434_v30  ;;  %5800 = vmatprep.subr.bf16.mxu0 %v8189_v1  ;;  %v239_v41 = vand.u32 4294901760, %v238_v32  ;;  %v2386_v43 = vand.u32 4294901760, %v6588_v34  ;;  %v8183_v46 = vand.u32 4294901760, %v6605_v37 }
  0x21   :  { %v246_v42 = vand.u32 4294901760, %v245_v33  ;;  %5926 = vmatprep.subr.bf16.mxu1 %v8189_v1  ;;  %v2393_v45 = vand.u32 4294901760, %v6593_v35  ;;  %v8180_v47 = vand.u32 4294901760, %v6607_v38  ;;  %v6622_v48 = vsub.f32 %v4435_v39, %v4435_v39 }
  0x22   :  { %vm79_vm14 = vcmp.eq.s32.totalorder %v6510_v9, %v6502_v7  ;;  %vm80_vm15 = vcmp.eq.s32.totalorder %v6513_v10, %v6502_v7  ;;  %vm2242_vm2 = vcmp.eq.s32.totalorder %v6510_v9, %v6507_v8  ;;  %vm2243_vm3 = vcmp.eq.s32.totalorder %v6513_v10, %v6507_v8 }
  0x23   :  { %v8179_v49 = vand.u32 4294901760, %v6613_v40  ;;  %v4369_v50 = vsel %vm79_vm14, 1.0, %v8193_v3  ;;  %v4370_v51 = vsel %vm80_vm15, 1.0, %v8193_v3  ;;  %vm6635_vm4 = vmpackc.low %vm80_vm15, %vm79_vm14  ;;  %v4436_v53 = vsel %vm2242_vm2, 1.0, %v8193_v3 }
  0x24   :  { %5802 = vmatpush3.bf16.msk.msra.mxu0 %vm6635_vm4, %v8177_v16  ;;  %v6643_v54 = vsub.f32 %v4369_v50, %v4369_v50  ;;  %v6645_v55 = vsub.f32 %v4370_v51, %v4370_v51  ;;  %v4437_v56 = vsel %vm2243_vm3, 1.0, %v8193_v3  ;;  %vm6648_vm5 = vmpackc.low %vm2243_vm3, %vm2242_vm2  ;;  %v6652_v58 = vsub.f32 %v4436_v53, %v4436_v53 }
  0x25   :  { %v8182_v59 = vand.u32 4294901760, %v6622_v48  ;;  %5928 = vmatpush3.bf16.msk.msra.mxu1 %vm6648_vm5, %v8177_v16  ;;  %v6658_v60 = vsub.f32 %v4437_v56, %v4437_v56  ;;  %4882 = vmatprep.subr.mxu0 %v8193_v3  ;;  %vm81_vm8 = vcmp.eq.s32.totalorder %v6557_v22, %v6502_v7  ;;  %vm2244_vm9 = vcmp.eq.s32.totalorder %v6557_v22, %v6507_v8  ;;  %v57_v7 = vld [vmem:[#allocation2] sm:$0xff] }
  0x26   :  { %v8181_v63 = vand.u32 4294901760, %v6643_v54  ;;  %v8185_v0 = vand.u32 4294901760, %v6645_v55  ;;  %5344 = vmatprep.subr.mxu1 %v8193_v3  ;;  %v4371_v11 = vsel %vm81_vm8, 1.0, %v8193_v3  ;;  %v8184_v12 = vand.u32 4294901760, %v6652_v58 }
  0x27   :  { %v8186_v14 = vand.u32 4294901760, %v6658_v60  ;;  %v4438_v15 = vsel %vm2244_vm9, 1.0, %v8193_v3  ;;  %v6684_v28 = vsub.f32 %v98_v44, %v6663_v61  ;;  %v8175_v30 = vmov 1.0  }
  0x28   :  { %4883 = vmatpush3.msk.msra.mxu0 %vm81_vm8, %v8175_v30  ;;  %v6693_v31 = vsub.f32 %v4371_v11, %v4371_v11  ;;  %v6695_v32 = vsub.f32 %v4438_v15, %v4438_v15  ;;  %v5804_v33 = vpack.c.bf16 %v246_v42, %v239_v41  ;;  %v101_v34 = vsel %vm96_vm1, %v48_v62, 0 }
  0x29   :  { %5345 = vmatpush3.msk.msra.mxu1 %vm2244_vm9, %v8175_v30  ;;  %v6703_v35 = vand.u32 4294901760, %v6684_v28  ;;  %5803 = vmatprep.subr.bf16.mxu0 %v8189_v1  ;;  %v6706_v39 = vand.u32 4294901760, %v101_v34  ;;  %v252_v44 = vsub.f32 %v6605_v37, %v8183_v46  ;;  %v259_v41 = vsub.f32 %v6607_v38, %v8180_v47 }
  0x2a   :  { %5929 = vmatprep.subr.bf16.mxu1 %v8189_v1  ;;  %v2399_v42 = vsub.f32 %v6613_v40, %v8179_v49  ;;  %v2406_v50 = vsub.f32 %v6622_v48, %v8182_v59  ;;  %v104_v51 = vsel %vm96_vm1, %v49_v29, 0  ;;  %v266_v53 = vsub.f32 %v6643_v54, %v8181_v63  ;;  %v50_v29 = vld [vmem:[%s8165_s0 + $0x18] sm:$0xff]  ;;  %v51_v63 = vld [vmem:[%s8165_s0 + $0x20] sm:$0x1] }
  0x2b   :  { %v187_v56 = vsub.f32 %v6684_v28, %v6703_v35  ;;  %v6728_v62 = vsub.f32 %v101_v34, %v6706_v39  ;;  %v253_v11 = vand.u32 4294901760, %v252_v44  ;;  %v260_v15 = vand.u32 4294901760, %v259_v41 }
  0x2c   :  { %v5930_v30 = vpack.c.bf16 %v2393_v45, %v2386_v43  ;;  %v2400_v16 = vand.u32 4294901760, %v2399_v42  ;;  %v2407_v49 = vand.u32 4294901760, %v2406_v50  ;;  %v6730_v47 = vand.u32 4294901760, %v104_v51 }
  0x2d   :  { %v188_v59 = vand.u32 4294901760, %v187_v56  ;;  %v6739_v46 = vand.u32 4294901760, %v6728_v62  ;;  %v267_v34 = vand.u32 4294901760, %v266_v53  ;;  %v273_v43 = vsub.f32 %v6645_v55, %v8185_v0 }
  0x2e   :  { %v5807_v45 = vpack.c.bf16 %v260_v15, %v253_v11  ;;  %v6745_v44 = vsub.f32 %v104_v51, %v6730_v47  ;;  %v2413_v41 = vsub.f32 %v6652_v58, %v8184_v12  ;;  %v2420_v42 = vsub.f32 %v6658_v60, %v8186_v14 }
  0x2f   :  { %4885 = vmatmul.mubr.f32.vlgmr.msra.gmra.mrb[0].mxu0 %v188_v59  ;;  %5347 = vmatmul.mubr.f32.vlgmr.msra.gmra.mrb[0].mxu1 %v188_v59  ;;  %v197_v50 = vsub.f32 %v6728_v62, %v6739_v46  ;;  %v5933_v53 = vpack.c.bf16 %v2407_v49, %v2400_v16  ;;  %v107_v56 = vsel %vm96_vm1, %v50_v29, 0  ;;  %v110_v11 = vsel %vm96_vm1, %v51_v63, 0 }
  0x30   :  { %5805 = vmatpush3.bf16.msra.mxu0 %v5804_v33  ;;  %5931 = vmatpush3.bf16.msra.mxu1 %v5930_v30  ;;  %v6758_v51 = vand.u32 4294901760, %v6745_v44  ;;  %v274_v15 = vand.u32 4294901760, %v273_v43  ;;  %v2414_v12 = vand.u32 4294901760, %v2413_v41  ;;  %v6760_v0 = vand.u32 4294901760, %v107_v56 }
  0x31   :  { %4887 = vmatprep.mubr.msk.f32.mxu0 %vm6415_vm0, %v8193_v3  ;;  %5349 = vmatprep.mubr.msk.f32.mxu1 %vm6415_vm0, %v8193_v3  ;;  %v198_v16 = vand.u32 4294901760, %v197_v50  ;;  %v2421_v49 = vand.u32 4294901760, %v2420_v42  ;;  %v6766_v59 = vand.u32 4294901760, %v110_v11  ;;  %v8188_v63 = vand.u32 4294901760, %v6693_v31 }
  0x32   :  { %5806 = vmatprep.subr.bf16.mxu0 %v8189_v1  ;;  %5932 = vmatprep.subr.bf16.mxu1 %v8189_v1  ;;  %v207_v30 = vsub.f32 %v6745_v44, %v6758_v51  ;;  %v6774_v33 = vsub.f32 %v107_v56, %v6760_v0  ;;  %v8187_v29 = vand.u32 4294901760, %v6695_v32  ;;  %v5810_v42 = vpack.c.bf16 %v274_v15, %v267_v34 }
  0x33   :  { %4888 = vmatmul.mubr.f32.gmra.mrb[2].mxu0 %v198_v16  ;;  %5350 = vmatmul.mubr.f32.gmra.mrb[2].mxu1 %v198_v16  ;;  %v6778_v43 = vsub.f32 %v110_v11, %v6766_v59  ;;  %v5936_v56 = vpack.c.bf16 %v2421_v49, %v2414_v12  ;;  %v6806_v11 = vpack.c.bf16 %v244_v24, %v237_v23  ;;  %v8209_v49 = vand.u32 4294901760, %v6605_v37 }
  0x34   :  { %5808 = vmatpush3.bf16.msra.mxu0 %v5807_v45  ;;  %5934 = vmatpush3.bf16.msra.mxu1 %v5933_v53  ;;  %v208_v41 = vand.u32 4294901760, %v207_v30  ;;  %v6781_v50 = vand.u32 4294901760, %v6774_v33  ;;  %v280_v45 = vsub.f32 %v6693_v31, %v8188_v63  ;;  %v2427_v34 = vsub.f32 %v6695_v32, %v8187_v29 }
  0x35   :  { %4890 = vmatprep.mubr.msk.f32.mxu0 %vm6415_vm0, %v8193_v3  ;;  %5352 = vmatprep.mubr.msk.f32.mxu1 %vm6415_vm0, %v8193_v3  ;;  %v6788_v14 = vand.u32 4294901760, %v6778_v43  ;;  %v6812_v15 = vpack.c.bf16 %v2391_v26, %v2384_v25  ;;  %v8210_v30 = vand.u32 4294901760, %v6607_v38  ;;  %v8211_v23 = vand.u32 4294901760, %v6613_v40 }
  0x36   :  { %5809 = vmatprep.subr.bf16.mxu0 %v8189_v1  ;;  %5935 = vmatprep.subr.bf16.mxu1 %v8189_v1  ;;  %v217_v53 = vsub.f32 %v6774_v33, %v6781_v50  ;;  %v8212_v24 = vand.u32 4294901760, %v6622_v48  ;;  %v8213_v25 = vand.u32 4294901760, %v6643_v54  ;;  %v8214_v26 = vand.u32 4294901760, %v6645_v55 }
  0x37   :  { %4891 = vmatmul.mubr.f32.gmra.mrb[4].mxu0 %v208_v41  ;;  %5353 = vmatmul.mubr.f32.gmra.mrb[4].mxu1 %v208_v41  ;;  %v227_v12 = vsub.f32 %v6778_v43, %v6788_v14  ;;  %v6820_v41 = vpack.c.bf16 %v8210_v30, %v8209_v49  ;;  %v8215_v49 = vand.u32 4294901760, %v6652_v58  ;;  %v8216_v30 = vand.u32 4294901760, %v6658_v60 }
  0x38   :  { %4893 = vmatprep.mubr.msk.f32.mxu0 %vm6415_vm0, %v8193_v3  ;;  %5811 = vmatpush3.bf16.msra.mxu0 %v5810_v42  ;;  %v218_v16 = vand.u32 4294901760, %v217_v53  ;;  %v6826_v29 = vpack.c.bf16 %v8212_v24, %v8211_v23  ;;  %v6832_v63 = vpack.c.bf16 %v8214_v26, %v8213_v25  ;;  %v281_v42 = vand.u32 4294901760, %v280_v45 }
  0x39   :  { %5355 = vmatprep.mubr.msk.f32.mxu1 %vm6415_vm0, %v8193_v3  ;;  %5937 = vmatpush3.bf16.msra.mxu1 %v5936_v56  ;;  %v2428_v53 = vand.u32 4294901760, %v2427_v34  ;;  %v6840_v1 = vpack.c.bf16 %v8216_v30, %v8215_v49  ;;  %v228_v23 = vand.u32 4294901760, %v227_v12  ;;  %v8217_v56 = vmov 0.0|0.0  }
  0x3a   :  { %4911 = vmatprep.subr.mxu0 %v8193_v3  ;;  %5373 = vmatprep.subr.mxu1 %v8193_v3  ;;  %v5813_v45 = vpack.c.bf16 %v6536_v18, %v6534_v17  ;;  %v5939_v34 = vpack.c.bf16 %v6544_v21, %v6542_v20  ;;  %v5816_v12 = vpack.c.bf16 %v6607_v38, %v6605_v37  ;;  %v6909_v20 = vld [vmem:[%s8169_s4] ss:$0 sm:$0xff]  ;;  %v8218_v37 = vmov 1.0|1.0  }
  0x3b   :  { %4894 = vmatmul.mubr.f32.gmra.mrb[6].mxu0 %v218_v16  ;;  %5356 = vmatmul.mubr.f32.gmra.mrb[6].mxu1 %v218_v16  ;;  %v5942_v16 = vpack.c.bf16 %v6622_v48, %v6613_v40  ;;  %v5819_v17 = vpack.c.bf16 %v6645_v55, %v6643_v54  ;;  %v5945_v18 = vpack.c.bf16 %v6658_v60, %v6652_v58  ;;  %v6916_v21 = vld [vmem:[%s8172_s7] ss:$0 sm:$0xff]  ;;  %v1493_v13 = vsel %vm96_vm1, %v57_v7, 0 }
  0x3c   :  { %4896 = vmatprep.mubr.msk.f32.mxu0 %vm6415_vm0, %v8193_v3  ;;  %5358 = vmatprep.mubr.msk.f32.mxu1 %vm6415_vm0, %v8193_v3  ;;  %vm813_vm10 = vcmp.eq.s32.totalorder %v6484_v2, %v6909_v20  ;;  %vm814_vm12 = vcmp.eq.s32.totalorder %v6491_v4, %v6909_v20  ;;  %vm2960_vm14 = vcmp.eq.s32.totalorder %v6484_v2, %v6916_v21 }
  0x3d   :  { %4912 = vmatpush3.msra.mxu0 %v281_v42  ;;  %5374 = vmatpush3.msra.mxu1 %v2428_v53  ;;  %v4394_v38 = vsel %vm813_vm10, 1.0, %v8193_v3  ;;  %v4395_v40 = vsel %vm814_vm12, 1.0, %v8193_v3  ;;  %vm2961_vm15 = vcmp.eq.s32.totalorder %v6491_v4, %v6916_v21  ;;  %v4461_v48 = vsel %vm2960_vm14, 1.0, %v8193_v3 }
  0x3e   :  { %5812 = vmatprep.subr.bf16.mxu0 %v8217_v56  ;;  %5938 = vmatprep.subr.bf16.mxu1 %v8217_v56  ;;  %v4462_v54 = vsel %vm2961_vm15, 1.0, %v8193_v3  ;;  %v6966_v55 = vsub.f32 %v4394_v38, %v4394_v38  ;;  %v6968_v58 = vsub.f32 %v4395_v40, %v4395_v40  ;;  %v6972_v60 = vsub.f32 %v4461_v48, %v4461_v48 }
  0x3f   :  { %4897 = vmatmul.mubr.f32.gmra.mrb[8].mxu0 %v228_v23  ;;  %5359 = vmatmul.mubr.f32.gmra.mrb[8].mxu1 %v228_v23  ;;  %v8219_v53 = vmov 1.0  }
  0x40   :  { %4913 = vmatprep.mubr.msk.f32.mxu0 %vm6415_vm0, %v8193_v3  ;;  %5375 = vmatprep.mubr.msk.f32.mxu1 %vm6415_vm0, %v8193_v3  ;;  %v962_v24 = vand.u32 4294901760, %v6968_v58 }
  0x43   :  { %4914 = vmatmul.mubr.f32.vlgmr.msra.gmra.mrb[0].mxu0 %v6663_v61  ;;  %5376 = vmatmul.mubr.f32.vlgmr.msra.gmra.mrb[0].mxu1 %v6663_v61 }
  0x44   :  { %5814 = vmatpush3.bf16.msra.mxu0 %v5813_v45  ;;  %5940 = vmatpush3.bf16.msra.mxu1 %v5939_v34 }
  0x45   :  { %4916 = vmatprep.mubr.msk.f32.mxu0 %vm6415_vm0, %v8193_v3  ;;  %5378 = vmatprep.mubr.msk.f32.mxu1 %vm6415_vm0, %v8193_v3 }
  0x46   :  { %5815 = vmatprep.subr.bf16.mxu0 %v8217_v56  ;;  %5941 = vmatprep.subr.bf16.mxu1 %v8217_v56 }
  0x47   :  { %4917 = vmatmul.mubr.f32.gmra.mrb[2].mxu0 %v6706_v39  ;;  %5379 = vmatmul.mubr.f32.gmra.mrb[2].mxu1 %v6706_v39 }
  0x48   :  { %5817 = vmatpush3.bf16.msra.mxu0 %v5816_v12  ;;  %5943 = vmatpush3.bf16.msra.mxu1 %v5942_v16 }
  0x49   :  { %4919 = vmatprep.mubr.msk.f32.mxu0 %vm6415_vm0, %v8193_v3  ;;  %5381 = vmatprep.mubr.msk.f32.mxu1 %vm6415_vm0, %v8193_v3 }
  0x4a   :  { %5818 = vmatprep.subr.bf16.mxu0 %v8217_v56  ;;  %5944 = vmatprep.subr.bf16.mxu1 %v8217_v56 }
  0x4b   :  { %4920 = vmatmul.mubr.f32.gmra.mrb[4].mxu0 %v6730_v47  ;;  %5382 = vmatmul.mubr.f32.gmra.mrb[4].mxu1 %v6730_v47 }
  0x4c   :  { %4922 = vmatprep.mubr.msk.f32.mxu0 %vm6415_vm0, %v8193_v3  ;;  %5820 = vmatpush3.bf16.msra.mxu0 %v5819_v17 }
  0x4d   :  { %5384 = vmatprep.mubr.msk.f32.mxu1 %vm6415_vm0, %v8193_v3  ;;  %5946 = vmatpush3.bf16.msra.mxu1 %v5945_v18 }
  0x4e   :  { %4940 = vmatprep.subr.mxu0 %v8193_v3  ;;  %5402 = vmatprep.subr.mxu1 %v8193_v3 }
  0x4f   :  { %4923 = vmatmul.mubr.f32.gmra.mrb[6].mxu0 %v6760_v0  ;;  %5385 = vmatmul.mubr.f32.gmra.mrb[6].mxu1 %v6760_v0 }
  0x50   :  { %4925 = vmatprep.mubr.msk.f32.mxu0 %vm6415_vm0, %v8193_v3  ;;  %5387 = vmatprep.mubr.msk.f32.mxu1 %vm6415_vm0, %v8193_v3 }
  0x51   :  { %4941 = vmatpush3.msra.mxu0 %v6693_v31  ;;  %5403 = vmatpush3.msra.mxu1 %v6695_v32 }
  0x52   :  { %5821 = vmatprep.subr.bf16.mxu0 %v8217_v56  ;;  %5947 = vmatprep.subr.bf16.mxu1 %v8217_v56 }
  0x53   :  { %4926 = vmatmul.mubr.f32.gmra.mrb[8].mxu0 %v6766_v59  ;;  %5388 = vmatmul.mubr.f32.gmra.mrb[8].mxu1 %v6766_v59 }
  0x54   :  { %4942 = vmatprep.mubr.msk.f32.mxu0 %vm6415_vm0, %v8193_v3  ;;  %5404 = vmatprep.mubr.msk.f32.mxu1 %vm6415_vm0, %v8193_v3 }
  0x57   :  { %4943 = vmatmul.mubr.f32.vlgmr.msra.gmra.mrb[0].mxu0 %v6684_v28  ;;  %5405 = vmatmul.mubr.f32.vlgmr.msra.gmra.mrb[0].mxu1 %v6684_v28  ;;  %v6974_v28 = vsub.f32 %v4462_v54, %v4462_v54 }
  0x58   :  { %5823 = vmatpush3.bf16.msk.msra.mxu0 %vm6525_vm6, %v8218_v37  ;;  %5949 = vmatpush3.bf16.msk.msra.mxu1 %vm6538_vm7, %v8218_v37 }
  0x59   :  { %4945 = vmatprep.mubr.msk.f32.mxu0 %vm6415_vm0, %v8193_v3  ;;  %5407 = vmatprep.mubr.msk.f32.mxu1 %vm6415_vm0, %v8193_v3  ;;  %v3093_v25 = vand.u32 4294901760, %v6974_v28 }
  0x5a   :  { %5824 = vmatprep.subr.bf16.mxu0 %v8217_v56  ;;  %5950 = vmatprep.subr.bf16.mxu1 %v8217_v56 }
  0x5b   :  { %4946 = vmatmul.mubr.f32.gmra.mrb[2].mxu0 %v6728_v62  ;;  %5408 = vmatmul.mubr.f32.gmra.mrb[2].mxu1 %v6728_v62  ;;  %v955_v62 = vand.u32 4294901760, %v6966_v55 }
  0x5c   :  { %5826 = vmatpush3.bf16.msk.msra.mxu0 %vm6564_vm11, %v8218_v37  ;;  %5952 = vmatpush3.bf16.msk.msra.mxu1 %vm6601_vm13, %v8218_v37 }
  0x5d   :  { %4948 = vmatprep.mubr.msk.f32.mxu0 %vm6415_vm0, %v8193_v3  ;;  %5410 = vmatprep.mubr.msk.f32.mxu1 %vm6415_vm0, %v8193_v3  ;;  %v7000_v26 = vpack.c.bf16 %v962_v24, %v955_v62 }
  0x5e   :  { %5827 = vmatprep.subr.bf16.mxu0 %v8217_v56  ;;  %5953 = vmatprep.subr.bf16.mxu1 %v8217_v56 }
  0x5f   :  { %4949 = vmatmul.mubr.f32.gmra.mrb[4].mxu0 %v6745_v44  ;;  %5411 = vmatmul.mubr.f32.gmra.mrb[4].mxu1 %v6745_v44  ;;  %v3086_v44 = vand.u32 4294901760, %v6972_v60 }
  0x60   :  { %4951 = vmatprep.mubr.msk.f32.mxu0 %vm6415_vm0, %v8193_v3  ;;  %5829 = vmatpush3.bf16.msk.msra.mxu0 %vm6635_vm4, %v8218_v37 }
  0x61   :  { %5413 = vmatprep.mubr.msk.f32.mxu1 %vm6415_vm0, %v8193_v3  ;;  %5955 = vmatpush3.bf16.msk.msra.mxu1 %vm6648_vm5, %v8218_v37  ;;  %v7010_v42 = vpack.c.bf16 %v3093_v25, %v3086_v44 }
  0x62   :  { %4969 = vmatprep.subr.mxu0 %v8193_v3  ;;  %5431 = vmatprep.subr.mxu1 %v8193_v3 }
  0x63   :  { %4952 = vmatmul.mubr.f32.gmra.mrb[6].mxu0 %v6774_v33  ;;  %5414 = vmatmul.mubr.f32.gmra.mrb[6].mxu1 %v6774_v33  ;;  %v3087_v33 = vsub.f32 %v6972_v60, %v3086_v44 }
  0x64   :  { %4954 = vmatprep.mubr.msk.f32.mxu0 %vm6415_vm0, %v8193_v3  ;;  %5416 = vmatprep.mubr.msk.f32.mxu1 %vm6415_vm0, %v8193_v3 }
  0x65   :  { %4970 = vmatpush3.msk.msra.mxu0 %vm81_vm8, %v8219_v53  ;;  %5432 = vmatpush3.msk.msra.mxu1 %vm2244_vm9, %v8219_v53  ;;  %v3088_v45 = vand.u32 4294901760, %v3087_v33 }
  0x66   :  { %5830 = vmatprep.subr.bf16.mxu0 %v8217_v56  ;;  %5956 = vmatprep.subr.bf16.mxu1 %v8217_v56 }
  0x67   :  { %4955 = vmatmul.mubr.f32.gmra.mrb[8].mxu0 %v6778_v43  ;;  %5417 = vmatmul.mubr.f32.gmra.mrb[8].mxu1 %v6778_v43 }
  0x68   :  { %4971 = vmatprep.mubr.msk.f32.mxu0 %vm6415_vm0, %v8193_v3  ;;  %5433 = vmatprep.mubr.msk.f32.mxu1 %vm6415_vm0, %v8193_v3 }
  0x6b   :  { %4972 = vmatmul.mubr.f32.vlgmr.msra.gmra.mrb[0].mxu0 %v6703_v35  ;;  %5434 = vmatmul.mubr.f32.vlgmr.msra.gmra.mrb[0].mxu1 %v6703_v35  ;;  %v8221_v35 = vand.u32 4294901760, %v6695_v32 }
  0x6c   :  { %5832 = vmatpush3.bf16.msra.mxu0 %v6806_v11  ;;  %5958 = vmatpush3.bf16.msra.mxu1 %v6812_v15 }
  0x6d   :  { %4974 = vmatprep.mubr.msk.f32.mxu0 %vm6415_vm0, %v8193_v3  ;;  %5436 = vmatprep.mubr.msk.f32.mxu1 %vm6415_vm0, %v8193_v3 }
  0x6e   :  { %5833 = vmatprep.subr.bf16.mxu0 %v8217_v56  ;;  %5959 = vmatprep.subr.bf16.mxu1 %v8217_v56 }
  0x6f   :  { %4975 = vmatmul.mubr.f32.gmra.mrb[2].mxu0 %v6739_v46  ;;  %5437 = vmatmul.mubr.f32.gmra.mrb[2].mxu1 %v6739_v46  ;;  %v8220_v46 = vand.u32 4294901760, %v6693_v31  ;;  %v55_v31 = vld [vmem:[%s8166_s1 + $0x18] sm:$0xff] }
  0x70   :  { %5835 = vmatpush3.bf16.msra.mxu0 %v6820_v41  ;;  %5961 = vmatpush3.bf16.msra.mxu1 %v6826_v29  ;;  %v3094_v29 = vsub.f32 %v6974_v28, %v3093_v25 }
  0x71   :  { %4977 = vmatprep.mubr.msk.f32.mxu0 %vm6415_vm0, %v8193_v3  ;;  %5439 = vmatprep.mubr.msk.f32.mxu1 %vm6415_vm0, %v8193_v3 }
  0x72   :  { %5836 = vmatprep.subr.bf16.mxu0 %v8217_v56  ;;  %5962 = vmatprep.subr.bf16.mxu1 %v8217_v56  ;;  %v3095_v34 = vand.u32 4294901760, %v3094_v29 }
  0x73   :  { %4978 = vmatmul.mubr.f32.gmra.mrb[4].mxu0 %v6758_v51  ;;  %5440 = vmatmul.mubr.f32.gmra.mrb[4].mxu1 %v6758_v51  ;;  %v956_v51 = vsub.f32 %v6966_v55, %v955_v62 }
  0x74   :  { %4980 = vmatprep.mubr.msk.f32.mxu0 %vm6415_vm0, %v8193_v3  ;;  %5838 = vmatpush3.bf16.msra.mxu0 %v6832_v63  ;;  %v5978_v38 = vpack.c.bf16 %v3095_v34, %v3088_v45 }
  0x75   :  { %5442 = vmatprep.mubr.msk.f32.mxu1 %vm6415_vm0, %v8193_v3  ;;  %5964 = vmatpush3.bf16.msra.mxu1 %v6840_v1  ;;  %v52_v1 = vld [vmem:[%s8166_s1] sm:$0xff]  ;;  %v957_v41 = vand.u32 4294901760, %v956_v51 }
  0x76   :  { %4998 = vmatprep.subr.mxu0 %v8193_v3  ;;  %5460 = vmatprep.subr.mxu1 %v8193_v3 }
  0x77   :  { %4981 = vmatmul.mubr.f32.gmra.mrb[6].mxu0 %v6781_v50  ;;  %5443 = vmatmul.mubr.f32.gmra.mrb[6].mxu1 %v6781_v50  ;;  %v56_v50 = vld [vmem:[%s8166_s1 + $0x20] sm:$0x1] }
  0x78   :  { %4983 = vmatprep.mubr.msk.f32.mxu0 %vm6415_vm0, %v8193_v3  ;;  %5445 = vmatprep.mubr.msk.f32.mxu1 %vm6415_vm0, %v8193_v3 }
  0x79   :  { %4999 = vmatpush3.msra.mxu0 %v8220_v46  ;;  %5461 = vmatpush3.msra.mxu1 %v8221_v35 }
  0x7a   :  { %5839 = vmatprep.subr.bf16.mxu0 %v8217_v56  ;;  %5965 = vmatprep.subr.bf16.mxu1 %v8217_v56 }
  0x7b   :  { %4984 = vmatmul.mubr.f32.gmra.mrb[8].mxu0 %v6788_v14  ;;  %5446 = vmatmul.mubr.f32.gmra.mrb[8].mxu1 %v6788_v14 }
  0x7c   :  { %5000 = vmatprep.mubr.msk.f32.mxu0 %vm6415_vm0, %v8193_v3  ;;  %5462 = vmatprep.mubr.msk.f32.mxu1 %vm6415_vm0, %v8193_v3 }
  0x7f   :  { %5001 = vmatmul.mubr.f32.vlgmr.msra.gmra.mrb[0].mxu0 %v6663_v61  ;;  %5463 = vmatmul.mubr.f32.vlgmr.msra.gmra.mrb[0].mxu1 %v6663_v61 }
  0x80   :  { %5841 = vmatpush3.bf16.msk.msra.mxu0 %vm6525_vm6, %v8218_v37  ;;  %5967 = vmatpush3.bf16.msk.msra.mxu1 %vm6538_vm7, %v8218_v37  ;;  %vm819_vm6 = vcmask 130048   ;;  %vm7149_vm7 = vmpackc.low %vm814_vm12, %vm813_vm10 }
  0x81   :  { %5003 = vmatprep.mubr.msk.f32.mxu0 %vm6415_vm0, %v8193_v3  ;;  %5465 = vmatprep.mubr.msk.f32.mxu1 %vm6415_vm0, %v8193_v3  ;;  %v821_v8 = vsel %vm819_vm6, %v52_v1, 0  ;;  %v824_v36 = vsel %vm819_vm6, %v53_v19, 0  ;;  %v827_v14 = vsel %vm819_vm6, %v54_v52, 0  ;;  %v830_v43 = vsel %vm819_vm6, %v55_v31, 0 }
  0x82   :  { %5842 = vmatprep.subr.bf16.mxu0 %v8217_v56  ;;  %5968 = vmatprep.subr.bf16.mxu1 %v8217_v56  ;;  %v7169_v27 = vand.u32 4294901760, %v821_v8  ;;  %v7202_v32 = vand.u32 4294901760, %v827_v14  ;;  %v7242_v30 = vand.u32 4294901760, %v830_v43  ;;  %v5855_v1 = vpack.c.bf16 %v6968_v58, %v6966_v55  ;;  %v7341_v55 = vld [vmem:[%s8170_s5] ss:$0 sm:$0xff]  ;;  %s6419_s5 = smov [#allocation5]  }
  0x83   :  { %5004 = vmatmul.mubr.f32.gmra.mrb[2].mxu0 %v6706_v39  ;;  %5466 = vmatmul.mubr.f32.gmra.mrb[2].mxu1 %v6706_v39  ;;  %vm1472_vm2 = vcmp.eq.s32.totalorder %v6491_v4, %v7341_v55  ;;  %vm1475_vm12 = vcmp.eq.s32.totalorder %v6510_v9, %v7341_v55 }
  0x84   :  { %5844 = vmatpush3.bf16.msk.msra.mxu0 %vm6564_vm11, %v8218_v37  ;;  %5970 = vmatpush3.bf16.msk.msra.mxu1 %vm6601_vm13, %v8218_v37  ;;  %vm7160_vm11 = vmpackc.low %vm2961_vm15, %vm2960_vm14  ;;  %v7190_v57 = vsub.f32 %v821_v8, %v7169_v27  ;;  %v7233_v11 = vsub.f32 %v827_v14, %v7202_v32  ;;  %v7257_v18 = vsub.f32 %v830_v43, %v7242_v30  ;;  %v4407_v34 = vsel %vm1475_vm12, 1.0, %v8193_v3 }
  0x85   :  { %5006 = vmatprep.mubr.msk.f32.mxu0 %vm6415_vm0, %v8193_v3  ;;  %5468 = vmatprep.mubr.msk.f32.mxu1 %vm6415_vm0, %v8193_v3  ;;  %v5981_v8 = vpack.c.bf16 %v6974_v28, %v6972_v60  ;;  %vm1471_vm13 = vcmp.eq.s32.totalorder %v6484_v2, %v7341_v55  ;;  %v4404_v28 = vsel %vm1472_vm2, 1.0, %v8193_v3  ;;  %vm1476_vm14 = vcmp.eq.s32.totalorder %v6513_v10, %v7341_v55 }
  0x86   :  { %5845 = vmatprep.subr.bf16.mxu0 %v8217_v56  ;;  %5971 = vmatprep.subr.bf16.mxu1 %v8217_v56  ;;  %v7250_v12 = vand.u32 4294901760, %v7233_v11  ;;  %v7268_v48 = vand.u32 4294901760, %v7257_v18  ;;  %v4403_v60 = vsel %vm1471_vm13, 1.0, %v8193_v3 }
  0x87   :  { %5007 = vmatmul.mubr.f32.gmra.mrb[4].mxu0 %v6730_v47  ;;  %5469 = vmatmul.mubr.f32.gmra.mrb[4].mxu1 %v6730_v47  ;;  %v7392_v52 = vsub.f32 %v4403_v60, %v4403_v60 }
  0x88   :  { %5009 = vmatprep.mubr.msk.f32.mxu0 %vm6415_vm0, %v8193_v3  ;;  %5847 = vmatpush3.bf16.msk.msra.mxu0 %vm6635_vm4, %v8218_v37  ;;  %v925_v40 = vsub.f32 %v7233_v11, %v7250_v12 }
  0x89   :  { %5471 = vmatprep.mubr.msk.f32.mxu1 %vm6415_vm0, %v8193_v3  ;;  %5973 = vmatpush3.bf16.msk.msra.mxu1 %vm6648_vm5, %v8218_v37  ;;  %vm1473_vm5 = vcmp.eq.s32.totalorder %v6494_v5, %v7341_v55 }
  0x8a   :  { %5027 = vmatprep.subr.mxu0 %v8193_v3  ;;  %5489 = vmatprep.subr.mxu1 %v8193_v3  ;;  %v926_v62 = vand.u32 4294901760, %v925_v40  ;;  %v4405_v31 = vsel %vm1473_vm5, 1.0, %v8193_v3 }
  0x8b   :  { %5010 = vmatmul.mubr.f32.gmra.mrb[6].mxu0 %v6760_v0  ;;  %5472 = vmatmul.mubr.f32.gmra.mrb[6].mxu1 %v6760_v0  ;;  %v7430_v29 = vsub.f32 %v4405_v31, %v4405_v31 }
  0x8c   :  { %5012 = vmatprep.mubr.msk.f32.mxu0 %vm6415_vm0, %v8193_v3  ;;  %5474 = vmatprep.mubr.msk.f32.mxu1 %vm6415_vm0, %v8193_v3 }
  0x8d   :  { %5028 = vmatpush3.msk.msra.mxu0 %vm81_vm8, %v8219_v53  ;;  %5490 = vmatpush3.msk.msra.mxu1 %vm2244_vm9, %v8219_v53  ;;  %vm1474_vm8 = vcmp.eq.s32.totalorder %v6497_v6, %v7341_v55 }
  0x8e   :  { %5848 = vmatprep.subr.bf16.mxu0 %v8217_v56  ;;  %5974 = vmatprep.subr.bf16.mxu1 %v8217_v56 }
  0x8f   :  { %5013 = vmatmul.mubr.f32.gmra.mrb[8].mxu0 %v6766_v59  ;;  %5475 = vmatmul.mubr.f32.gmra.mrb[8].mxu1 %v6766_v59 }
  0x90   :  { %5029 = vmatprep.mubr.msk.f32.mxu0 %vm6415_vm0, %v8193_v3  ;;  %5491 = vmatprep.mubr.msk.f32.mxu1 %vm6415_vm0, %v8193_v3 }
  0x93   :  { %5030 = vmatmul.mubr.f32.vlgmr.msra.gmra.mrb[0].mxu0 %v6663_v61  ;;  %5492 = vmatmul.mubr.f32.vlgmr.msra.gmra.mrb[0].mxu1 %v6663_v61  ;;  %v7192_v61 = vand.u32 4294901760, %v824_v36 }
  0x94   :  { %5850 = vmatpush3.bf16.msk.msra.mxu0 %vm7149_vm7, %v8218_v37  ;;  %5976 = vmatpush3.bf16.msk.msra.mxu1 %vm7160_vm11, %v8218_v37 }
  0x95   :  { %5032 = vmatprep.mubr.msk.f32.mxu0 %vm6415_vm0, %v8193_v3  ;;  %5494 = vmatprep.mubr.msk.f32.mxu1 %vm6415_vm0, %v8193_v3  ;;  %v7213_v63 = vsub.f32 %v824_v36, %v7192_v61 }
  0x96   :  { %5851 = vmatprep.subr.bf16.mxu0 %v8217_v56  ;;  %5977 = vmatprep.subr.bf16.mxu1 %v8217_v56 }
  0x97   :  { %5033 = vmatmul.mubr.f32.gmra.mrb[2].mxu0 %v6706_v39  ;;  %5495 = vmatmul.mubr.f32.gmra.mrb[2].mxu1 %v6706_v39  ;;  %v7207_v39 = vand.u32 4294901760, %v7190_v57  ;;  %v7240_v49 = vand.u32 4294901760, %v7213_v63 }
  0x98   :  { %5035 = vmatprep.mubr.msk.f32.mxu0 %vm6415_vm0, %v8193_v3  ;;  %5497 = vmatprep.mubr.msk.f32.mxu1 %vm6415_vm0, %v8193_v3 }
  0x99   :  { %v905_v15 = vsub.f32 %v7190_v57, %v7207_v39  ;;  %v915_v17 = vsub.f32 %v7213_v63, %v7240_v49 }
  0x9b   :  { %5036 = vmatmul.mubr.f32.gmra.mrb[4].mxu0 %v6730_v47  ;;  %5498 = vmatmul.mubr.f32.gmra.mrb[4].mxu1 %v6730_v47  ;;  %v963_v47 = vsub.f32 %v6968_v58, %v962_v24  ;;  %v906_v16 = vand.u32 4294901760, %v905_v15  ;;  %v935_v24 = vsub.f32 %v7257_v18, %v7268_v48  ;;  %v7346_v58 = vld [vmem:[%s8173_s8] ss:$0 sm:$0xff]  ;;  %v1632_v15 = vand.u32 4294901760, %v7392_v52  ;;  %s4355_s8 = sshll.u32 %s6419_s5, 4  ;;  %s4356_s8 = int_to_ptr.vmem [resolvable:$true] %s4355_s8 }
  0x9c   :  { %5038 = vmatprep.mubr.msk.f32.mxu0 %vm6415_vm0, %v8193_v3  ;;  %5500 = vmatprep.mubr.msk.f32.mxu1 %vm6415_vm0, %v8193_v3  ;;  %vm3602_vm3 = vcmp.eq.s32.totalorder %v6484_v2, %v7346_v58  ;;  %vm3603_vm4 = vcmp.eq.s32.totalorder %v6491_v4, %v7346_v58  ;;  %vm3604_vm9 = vcmp.eq.s32.totalorder %v6494_v5, %v7346_v58  ;;  %v59_v4 = vld [vmem:[#allocation2 + $0x10] sm:$0xff]  ;;  %s6385_s3 = scalar_lea.vmem %s4356_s8, 32  ;;  %p6390_p9 = scmp.lt.s32.totalorder %s4356_s8, %s4356_s8 }
  0x9d   :  { %v964_v23 = vand.u32 4294901760, %v963_v47  ;;  %v936_v25 = vand.u32 4294901760, %v935_v24  ;;  %v4470_v19 = vsel %vm3602_vm3, 1.0, %v8193_v3  ;;  %v4471_v36 = vsel %vm3603_vm4, 1.0, %v8193_v3  ;;  %p6386_p8 = scmp.ne.s32.totalorder %s4356_s8, %s6385_s3  ;;  %p6391_p10 = scmp.lt.s32.totalorder %s6385_s3, %s6385_s3 }
  0x9e   :  { %v7398_v14 = vsub.f32 %v4470_v19, %v4470_v19  ;;  %v7408_v51 = vsub.f32 %v4471_v36, %v4471_v36  ;;  %vm3605_vm10 = vcmp.eq.s32.totalorder %v6497_v6, %v7346_v58  ;;  %v4472_v47 = vsel %vm3604_vm9, 1.0, %v8193_v3  ;;  %v60_v6 = vld [vmem:[#allocation2 + $0x18] sm:$0xff] }
  0x9f   :  { %5039 = vmatmul.mubr.f32.gmra.mrb[6].mxu0 %v6760_v0  ;;  %5501 = vmatmul.mubr.f32.gmra.mrb[6].mxu1 %v6760_v0  ;;  %v833_v0 = vsel %vm819_vm6, %v56_v50, 0  ;;  %v5852_v21 = vpack.c.bf16 %v964_v23, %v957_v41  ;;  %v4473_v33 = vsel %vm3605_vm10, 1.0, %v8193_v3  ;;  %v7434_v50 = vsub.f32 %v4472_v47, %v4472_v47  ;;  %p6392_p11 = por %p6391_p10, %p6390_p9 }
  0xa0   :  { %5041 = vmatprep.mubr.msk.f32.mxu0 %vm6415_vm0, %v8193_v3  ;;  %5503 = vmatprep.mubr.msk.f32.mxu1 %vm6415_vm0, %v8193_v3  ;;  %v7259_v20 = vand.u32 4294901760, %v833_v0  ;;  %v7438_v41 = vsub.f32 %v4473_v33, %v4473_v33  ;;  %v3748_v23 = vand.u32 4294901760, %v7398_v14  ;;  %v3755_v45 = vand.u32 4294901760, %v7408_v51 }
  0xa1   :  { %vm3606_vm15 = vcmp.eq.s32.totalorder %v6510_v9, %v7346_v58  ;;  %vm3607_vm6 = vcmp.eq.s32.totalorder %v6513_v10, %v7346_v58  ;;  %v3762_v40 = vand.u32 4294901760, %v7434_v50  ;;  %v7490_v24 = vsub.f32 %v4407_v34, %v4407_v34  ;;  %p6393_p12 = pnand %p6392_p11, %p6386_p8 }
  0xa2   :  { %v7271_v54 = vsub.f32 %v833_v0, %v7259_v20  ;;  %v1499_v5 = vsel %vm96_vm1, %v59_v4, 0  ;;  %v1633_v34 = vsub.f32 %v7392_v52, %v1632_v15  ;;  %v3749_v9 = vsub.f32 %v7398_v14, %v3748_v23 }
  0xa3   :  { %5042 = vmatmul.mubr.f32.gmra.mrb[8].mxu0 %v6766_v59  ;;  %5504 = vmatmul.mubr.f32.gmra.mrb[8].mxu1 %v6766_v59  ;;  %v916_v59 = vand.u32 4294901760, %v915_v17  ;;  %v7474_v17 = vpack.c.bf16 %v3755_v45, %v3748_v23  ;;  %v3756_v10 = vsub.f32 %v7408_v51, %v3755_v45  ;;  %v61_v23 = vld [vmem:[#allocation2 + $0x20] sm:$0x1] }
  0xa4   :  { %5048 = vmatprep.mubr.msk.f32.mxu0 %vm6415_vm0, %v8193_v3  ;;  %5510 = vmatprep.mubr.msk.f32.mxu1 %vm6415_vm0, %v8193_v3  ;;  %v7282_v44 = vand.u32 4294901760, %v7271_v54  ;;  %v1634_v45 = vand.u32 4294901760, %v1633_v34 }
  0xa6   :  { %v945_v46 = vsub.f32 %v7271_v54, %v7282_v44 }
  0xa7   :  { %5049 = vmatmul.mubr.f32.vlgmr.msra.gmra.mrb[10].mxu0 %v906_v16  ;;  %5511 = vmatmul.mubr.f32.vlgmr.msra.gmra.mrb[10].mxu1 %v906_v16  ;;  %v4408_v16 = vsel %vm1476_vm14, 1.0, %v8193_v3 }
  0xa8   :  { %5853 = vmatpush3.bf16.msra.mxu0 %v5852_v21  ;;  %5979 = vmatpush3.bf16.msra.mxu1 %v5978_v38  ;;  %v946_v35 = vand.u32 4294901760, %v945_v46  ;;  %v4475_v21 = vsel %vm3607_vm6, 1.0, %v8193_v3  ;;  %v1646_v38 = vand.u32 4294901760, %v7430_v29 }
  0xa9   :  { %5051 = vmatprep.mubr.msk.f32.mxu0 %vm6415_vm0, %v8193_v3  ;;  %5513 = vmatprep.mubr.msk.f32.mxu1 %vm6415_vm0, %v8193_v3 }
  0xaa   :  { %5854 = vmatprep.subr.bf16.mxu0 %v8217_v56  ;;  %5980 = vmatprep.subr.bf16.mxu1 %v8217_v56  ;;  %v1647_v4 = vsub.f32 %v7430_v29, %v1646_v38 }
  0xab   :  { %5052 = vmatmul.mubr.f32.gmra.mrb[12].mxu0 %v916_v59  ;;  %5514 = vmatmul.mubr.f32.gmra.mrb[12].mxu1 %v916_v59 }
  0xac   :  { %5054 = vmatprep.mubr.msk.f32.mxu0 %vm6415_vm0, %v8193_v3  ;;  %5516 = vmatprep.mubr.msk.f32.mxu1 %vm6415_vm0, %v8193_v3 }
  0xaf   :  { %5055 = vmatmul.mubr.f32.gmra.mrb[14].mxu0 %v926_v62  ;;  %5517 = vmatmul.mubr.f32.gmra.mrb[14].mxu1 %v926_v62  ;;  %v3769_v62 = vand.u32 4294901760, %v7438_v41 }
  0xb0   :  { %5057 = vmatprep.mubr.msk.f32.mxu0 %vm6415_vm0, %v8193_v3  ;;  %5519 = vmatprep.mubr.msk.f32.mxu1 %vm6415_vm0, %v8193_v3 }
  0xb3   :  { %5058 = vmatmul.mubr.f32.gmra.mrb[16].mxu0 %v936_v25  ;;  %5520 = vmatmul.mubr.f32.gmra.mrb[16].mxu1 %v936_v25  ;;  %v7492_v25 = vsub.f32 %v4408_v16, %v4408_v16 }
  0xb4   :  { %5060 = vmatprep.mubr.msk.f32.mxu0 %vm6415_vm0, %v8193_v3  ;;  %5522 = vmatprep.mubr.msk.f32.mxu1 %vm6415_vm0, %v8193_v3 }
  0xb5   :  { %v1667_v60 = vand.u32 4294901760, %v7492_v25 }
  0xb7   :  { %5061 = vmatmul.mubr.f32.gmra.mrb[8].mxu0 %v946_v35  ;;  %5523 = vmatmul.mubr.f32.gmra.mrb[8].mxu1 %v946_v35 }
  0xb8   :  { %5067 = vmatprep.mubr.msk.f32.mxu0 %vm6415_vm0, %v8193_v3  ;;  %5529 = vmatprep.mubr.msk.f32.mxu1 %vm6415_vm0, %v8193_v3 }
  0xbb   :  { %5068 = vmatmul.mubr.f32.vlgmr.msra.gmra.mrb[10].mxu0 %v7169_v27  ;;  %5530 = vmatmul.mubr.f32.vlgmr.msra.gmra.mrb[10].mxu1 %v7169_v27 }
  0xbc   :  { %5856 = vmatpush3.bf16.msra.mxu0 %v5855_v1  ;;  %5982 = vmatpush3.bf16.msra.mxu1 %v5981_v8  ;;  %v7506_v1 = vsub.f32 %v4475_v21, %v4475_v21  ;;  %v1660_v8 = vand.u32 4294901760, %v7490_v24 }
  0xbd   :  { %5070 = vmatprep.mubr.msk.f32.mxu0 %vm6415_vm0, %v8193_v3  ;;  %5532 = vmatprep.mubr.msk.f32.mxu1 %vm6415_vm0, %v8193_v3 }
  0xbe   :  { %5857 = vmatprep.subr.bf16.mxu0 %v8217_v56  ;;  %5983 = vmatprep.subr.bf16.mxu1 %v8217_v56  ;;  %v8191_v19 = vand.u32 4294901760, %v7506_v1 }
  0xbf   :  { %5071 = vmatmul.mubr.f32.gmra.mrb[12].mxu0 %v7192_v61  ;;  %5533 = vmatmul.mubr.f32.gmra.mrb[12].mxu1 %v7192_v61 }
  0xc0   :  { %5073 = vmatprep.mubr.msk.f32.mxu0 %vm6415_vm0, %v8193_v3  ;;  %5535 = vmatprep.mubr.msk.f32.mxu1 %vm6415_vm0, %v8193_v3 }
  0xc3   :  { %5074 = vmatmul.mubr.f32.gmra.mrb[14].mxu0 %v7202_v32  ;;  %5536 = vmatmul.mubr.f32.gmra.mrb[14].mxu1 %v7202_v32 }
  0xc4   :  { %5076 = vmatprep.mubr.msk.f32.mxu0 %vm6415_vm0, %v8193_v3  ;;  %5538 = vmatprep.mubr.msk.f32.mxu1 %vm6415_vm0, %v8193_v3 }
  0xc7   :  { %5077 = vmatmul.mubr.f32.gmra.mrb[16].mxu0 %v7242_v30  ;;  %5539 = vmatmul.mubr.f32.gmra.mrb[16].mxu1 %v7242_v30 }
  0xc8   :  { %5079 = vmatprep.mubr.msk.f32.mxu0 %vm6415_vm0, %v8193_v3  ;;  %5541 = vmatprep.mubr.msk.f32.mxu1 %vm6415_vm0, %v8193_v3 }
  0xcb   :  { %5080 = vmatmul.mubr.f32.gmra.mrb[8].mxu0 %v7259_v20  ;;  %5542 = vmatmul.mubr.f32.gmra.mrb[8].mxu1 %v7259_v20 }
  0xcc   :  { %5086 = vmatprep.mubr.msk.f32.mxu0 %vm6415_vm0, %v8193_v3  ;;  %5548 = vmatprep.mubr.msk.f32.mxu1 %vm6415_vm0, %v8193_v3 }
  0xcf   :  { %5087 = vmatmul.mubr.f32.vlgmr.msra.gmra.mrb[10].mxu0 %v7190_v57  ;;  %5549 = vmatmul.mubr.f32.vlgmr.msra.gmra.mrb[10].mxu1 %v7190_v57  ;;  %v7394_v57 = vsub.f32 %v4404_v28, %v4404_v28 }
  0xd0   :  { %5859 = vmatpush3.bf16.msk.msra.mxu0 %vm7149_vm7, %v8218_v37  ;;  %5985 = vmatpush3.bf16.msk.msra.mxu1 %vm7160_vm11, %v8218_v37 }
  0xd1   :  { %5089 = vmatprep.mubr.msk.f32.mxu0 %vm6415_vm0, %v8193_v3  ;;  %5551 = vmatprep.mubr.msk.f32.mxu1 %vm6415_vm0, %v8193_v3 }
  0xd2   :  { %5860 = vmatprep.subr.bf16.mxu0 %v8217_v56  ;;  %5986 = vmatprep.subr.bf16.mxu1 %v8217_v56 }
  0xd3   :  { %5090 = vmatmul.mubr.f32.gmra.mrb[12].mxu0 %v7213_v63  ;;  %5552 = vmatmul.mubr.f32.gmra.mrb[12].mxu1 %v7213_v63  ;;  %v4406_v63 = vsel %vm1474_vm8, 1.0, %v8193_v3 }
  0xd4   :  { %5092 = vmatprep.mubr.msk.f32.mxu0 %vm6415_vm0, %v8193_v3  ;;  %5554 = vmatprep.mubr.msk.f32.mxu1 %vm6415_vm0, %v8193_v3  ;;  %v7432_v43 = vsub.f32 %v4406_v63, %v4406_v63 }
  0xd6   :  { %v1653_v59 = vand.u32 4294901760, %v7432_v43 }
  0xd7   :  { %5093 = vmatmul.mubr.f32.gmra.mrb[14].mxu0 %v7233_v11  ;;  %5555 = vmatmul.mubr.f32.gmra.mrb[14].mxu1 %v7233_v11  ;;  %v1639_v11 = vand.u32 4294901760, %v7394_v57 }
  0xd8   :  { %5095 = vmatprep.mubr.msk.f32.mxu0 %vm6415_vm0, %v8193_v3  ;;  %5557 = vmatprep.mubr.msk.f32.mxu1 %vm6415_vm0, %v8193_v3  ;;  %v7498_v46 = vpack.c.bf16 %v1653_v59, %v1646_v38  ;;  %v1505_v38 = vsel %vm96_vm1, %v61_v23, 0 }
  0xd9   :  { %v7456_v0 = vpack.c.bf16 %v1639_v11, %v1632_v15  ;;  %v1640_v16 = vsub.f32 %v7394_v57, %v1639_v11  ;;  %v1502_v15 = vsel %vm96_vm1, %v60_v6, 0  ;;  %v1654_v6 = vsub.f32 %v7432_v43, %v1653_v59 }
  0xdb   :  { %5096 = vmatmul.mubr.f32.gmra.mrb[16].mxu0 %v7257_v18  ;;  %5558 = vmatmul.mubr.f32.gmra.mrb[16].mxu1 %v7257_v18  ;;  %v4474_v18 = vsel %vm3606_vm15, 1.0, %v8193_v3  ;;  %v1641_v21 = vand.u32 4294901760, %v1640_v16 }
  0xdc   :  { %5098 = vmatprep.mubr.msk.f32.mxu0 %vm6415_vm0, %v8193_v3  ;;  %5560 = vmatprep.mubr.msk.f32.mxu1 %vm6415_vm0, %v8193_v3  ;;  %v7504_v35 = vsub.f32 %v4474_v18, %v4474_v18  ;;  %v7712_v18 = vand.u32 4294901760, %v1499_v5 }
  0xdd   :  { %v5876_v34 = vpack.c.bf16 %v1641_v21, %v1634_v45 }
  0xde   :  { %v8192_v28 = vand.u32 4294901760, %v7504_v35  ;;  %v7745_v7 = vsub.f32 %v1499_v5, %v7712_v18  ;;  %v3770_v5 = vsub.f32 %v7438_v41, %v3769_v62 }
  0xdf   :  { %5099 = vmatmul.mubr.f32.gmra.mrb[8].mxu0 %v7271_v54  ;;  %5561 = vmatmul.mubr.f32.gmra.mrb[8].mxu1 %v7271_v54  ;;  %v7512_v54 = vpack.c.bf16 %v3769_v62, %v3762_v40 }
  0xe0   :  { %5105 = vmatprep.mubr.msk.f32.mxu0 %vm6415_vm0, %v8193_v3  ;;  %5567 = vmatprep.mubr.msk.f32.mxu1 %vm6415_vm0, %v8193_v3  ;;  %v3771_v21 = vand.u32 4294901760, %v3770_v5 }
  0xe1   :  { %8226 = vst [vmem:[#allocation8_spill] sm:$0xff] %v7512_v54  ;;  %v8244_v54 = vmov 0.0  }
  0xe3   :  { %5106 = vmatmul.mubr.f32.vlgmr.msra.gmra.mrb[10].mxu0 %v7207_v39  ;;  %5568 = vmatmul.mubr.f32.vlgmr.msra.gmra.mrb[10].mxu1 %v7207_v39  ;;  %v58_v39 = vld [vmem:[#allocation2 + $0x8] sm:$0xff] }
  0xe4   :  { %5862 = vmatpush3.bf16.msra.mxu0 %v7000_v26  ;;  %5988 = vmatpush3.bf16.msra.mxu1 %v7010_v42  ;;  %v7532_v26 = vpack.c.bf16 %v1667_v60, %v1660_v8  ;;  %v7538_v42 = vpack.c.bf16 %v8191_v19, %v8192_v28  ;;  %v1655_v19 = vand.u32 4294901760, %v1654_v6  ;;  %v7796_v28 = vand.u32 4294901760, %v1505_v38 }
  0xe5   :  { %5108 = vmatprep.mubr.msk.f32.mxu0 %vm6415_vm0, %v8193_v3  ;;  %5570 = vmatprep.mubr.msk.f32.mxu1 %vm6415_vm0, %v8193_v3 }
  0xe6   :  { %5863 = vmatprep.subr.bf16.mxu0 %v8217_v56  ;;  %5989 = vmatprep.subr.bf16.mxu1 %v8217_v56  ;;  %8227 = vst [vmem:[#allocation9_spill] sm:$0xff] %v7532_v26  ;;  %8228 = vst [vmem:[#allocation10_spill] sm:$0xff] %v7538_v42 }
  0xe7   :  { %5109 = vmatmul.mubr.f32.gmra.mrb[12].mxu0 %v7240_v49  ;;  %5571 = vmatmul.mubr.f32.gmra.mrb[12].mxu1 %v7240_v49 }
  0xe8   :  { %5111 = vmatprep.mubr.msk.f32.mxu0 %vm6415_vm0, %v8193_v3  ;;  %5573 = vmatprep.mubr.msk.f32.mxu1 %vm6415_vm0, %v8193_v3 }
  0xeb   :  { %5112 = vmatmul.mubr.f32.gmra.mrb[14].mxu0 %v7250_v12  ;;  %5574 = vmatmul.mubr.f32.gmra.mrb[14].mxu1 %v7250_v12 }
  0xec   :  { %5114 = vmatprep.mubr.msk.f32.mxu0 %vm6415_vm0, %v8193_v3  ;;  %5576 = vmatprep.mubr.msk.f32.mxu1 %vm6415_vm0, %v8193_v3 }
  0xef   :  { %5115 = vmatmul.mubr.f32.gmra.mrb[16].mxu0 %v7268_v48  ;;  %5577 = vmatmul.mubr.f32.gmra.mrb[16].mxu1 %v7268_v48  ;;  %v7623_v48 = vand.u32 4294901760, %v1493_v13 }
  0xf0   :  { %5117 = vmatprep.mubr.msk.f32.mxu0 %vm6415_vm0, %v8193_v3  ;;  %5579 = vmatprep.mubr.msk.f32.mxu1 %vm6415_vm0, %v8193_v3 }
  0xf1   :  { %v7659_v36 = vsub.f32 %v1493_v13, %v7623_v48  ;;  %v7747_v13 = vand.u32 4294901760, %v1502_v15 }
  0xf3   :  { %5118 = vmatmul.mubr.f32.gmra.mrb[8].mxu0 %v7282_v44  ;;  %5580 = vmatmul.mubr.f32.gmra.mrb[8].mxu1 %v7282_v44  ;;  %v1496_v44 = vsel %vm96_vm1, %v58_v39, 0  ;;  %v7689_v63 = vand.u32 4294901760, %v7659_v36  ;;  %v3750_v39 = vand.u32 4294901760, %v3749_v9  ;;  %v7789_v9 = vand.u32 4294901760, %v7745_v7 }
  0xf4   :  { %5124 = vmatprep.mubr.msk.f32.mxu0 %vm6415_vm0, %v8193_v3  ;;  %5586 = vmatprep.mubr.msk.f32.mxu1 %vm6415_vm0, %v8193_v3  ;;  %v7661_v31 = vand.u32 4294901760, %v1496_v44 }
  0xf5   :  { %8241 = vst [vmem:[#allocation11_spill] sm:$0xff] %v7789_v9 }
  0xf6   :  { %v7692_v47 = vsub.f32 %v1496_v44, %v7661_v31  ;;  %v3757_v44 = vand.u32 4294901760, %v3756_v10  ;;  %v7792_v10 = vsub.f32 %v1502_v15, %v7747_v13  ;;  %v1661_v15 = vsub.f32 %v7490_v24, %v1660_v8 }
  0xf7   :  { %5125 = vmatmul.mubr.f32.vlgmr.msra.gmra.mrb[10].mxu0 %v7169_v27  ;;  %5587 = vmatmul.mubr.f32.vlgmr.msra.gmra.mrb[10].mxu1 %v7169_v27  ;;  %v1602_v8 = vsub.f32 %v7745_v7, %v7789_v9 }
  0xf8   :  { %5865 = vmatpush3.bf16.msk.msra.mxu0 %vm7149_vm7, %v8218_v37  ;;  %5991 = vmatpush3.bf16.msk.msra.mxu1 %vm7160_vm11, %v8218_v37  ;;  %vm7609_vm7 = vmpackc.low %vm1472_vm2, %vm1471_vm13  ;;  %v7740_v11 = vand.u32 4294901760, %v7692_v47  ;;  %v6002_v23 = vpack.c.bf16 %v3757_v44, %v3750_v39  ;;  %v1662_v42 = vand.u32 4294901760, %v1661_v15 }
  0xf9   :  { %5127 = vmatprep.mubr.msk.f32.mxu0 %vm6415_vm0, %v8193_v3  ;;  %5589 = vmatprep.mubr.msk.f32.mxu1 %vm6415_vm0, %v8193_v3  ;;  %vm7619_vm11 = vmpackc.low %vm3603_vm4, %vm3602_vm3 }
  0xfa   :  { %5866 = vmatprep.subr.bf16.mxu0 %v8217_v56  ;;  %5992 = vmatprep.subr.bf16.mxu1 %v8217_v56  ;;  %vm7640_vm13 = vmpackc.low %vm1474_vm8, %vm1473_vm5  ;;  %vm1477_vm5 = vcmp.eq.s32.totalorder %v6557_v22, %v7341_v55  ;;  %vm3608_vm8 = vcmp.eq.s32.totalorder %v6557_v22, %v7346_v58  ;;  %v1592_v16 = vsub.f32 %v7692_v47, %v7740_v11 }
  0xfb   :  { %5128 = vmatmul.mubr.f32.gmra.mrb[12].mxu0 %v7192_v61  ;;  %5590 = vmatmul.mubr.f32.gmra.mrb[12].mxu1 %v7192_v61  ;;  %vm7654_vm2 = vmpackc.low %vm3605_vm10, %vm3604_vm9  ;;  %v4409_v59 = vsel %vm1477_vm5, 1.0, %v8193_v3 }
  0xfc   :  { %5130 = vmatprep.mubr.msk.f32.mxu0 %vm6415_vm0, %v8193_v3  ;;  %5592 = vmatprep.mubr.msk.f32.mxu1 %vm6415_vm0, %v8193_v3  ;;  %vm7684_vm3 = vmpackc.low %vm1476_vm14, %vm1475_vm12  ;;  %v7808_v39 = vsub.f32 %v4409_v59, %v4409_v59  ;;  %v1593_v5 = vand.u32 4294901760, %v1592_v16  ;;  %v7824_v59 = vsub.f32 %v1505_v38, %v7796_v28 }
  0xfd   :  { %vm7702_vm4 = vmpackc.low %vm3607_vm6, %vm3606_vm15 }
  0xfe   :  { %v1674_v16 = vand.u32 4294901760, %v7808_v39 }
  0xff   :  { %5131 = vmatmul.mubr.f32.gmra.mrb[14].mxu0 %v7202_v32  ;;  %5593 = vmatmul.mubr.f32.gmra.mrb[14].mxu1 %v7202_v32 }
 0x100   :  { %5133 = vmatprep.mubr.msk.f32.mxu0 %vm6415_vm0, %v8193_v3  ;;  %5595 = vmatprep.mubr.msk.f32.mxu1 %vm6415_vm0, %v8193_v3 }
 0x103   :  { %5134 = vmatmul.mubr.f32.gmra.mrb[16].mxu0 %v7242_v30  ;;  %5596 = vmatmul.mubr.f32.gmra.mrb[16].mxu1 %v7242_v30 }
 0x104   :  { %5136 = vmatprep.mubr.msk.f32.mxu0 %vm6415_vm0, %v8193_v3  ;;  %5598 = vmatprep.mubr.msk.f32.mxu1 %vm6415_vm0, %v8193_v3 }
 0x107   :  { %5137 = vmatmul.mubr.f32.gmra.mrb[8].mxu0 %v7259_v20  ;;  %5599 = vmatmul.mubr.f32.gmra.mrb[8].mxu1 %v7259_v20 }
 0x108   :  { %5143 = vmatprep.mubr.msk.f32.mxu0 %vm6415_vm0, %v8193_v3  ;;  %5605 = vmatprep.mubr.msk.f32.mxu1 %vm6415_vm0, %v8193_v3 }
 0x10b   :  { %5144 = vmatmul.mubr.f32.vlgmr.msra.gmra.mrb[10].mxu0 %v7169_v27  ;;  %5606 = vmatmul.mubr.f32.vlgmr.msra.gmra.mrb[10].mxu1 %v7169_v27 }
 0x10c   :  { %5868 = vmatpush3.bf16.msk.msra.mxu0 %vm7609_vm7, %v8218_v37  ;;  %5994 = vmatpush3.bf16.msk.msra.mxu1 %vm7619_vm11, %v8218_v37 }
 0x10d   :  { %5146 = vmatprep.mubr.msk.f32.mxu0 %vm6415_vm0, %v8193_v3  ;;  %5608 = vmatprep.mubr.msk.f32.mxu1 %vm6415_vm0, %v8193_v3 }
 0x10e   :  { %5869 = vmatprep.subr.bf16.mxu0 %v8217_v56  ;;  %5995 = vmatprep.subr.bf16.mxu1 %v8217_v56 }
 0x10f   :  { %5147 = vmatmul.mubr.f32.gmra.mrb[12].mxu0 %v7192_v61  ;;  %5609 = vmatmul.mubr.f32.gmra.mrb[12].mxu1 %v7192_v61 }
 0x110   :  { %5871 = vmatpush3.bf16.msk.msra.mxu0 %vm7640_vm13, %v8218_v37  ;;  %5997 = vmatpush3.bf16.msk.msra.mxu1 %vm7654_vm2, %v8218_v37 }
 0x111   :  { %5149 = vmatprep.mubr.msk.f32.mxu0 %vm6415_vm0, %v8193_v3  ;;  %5611 = vmatprep.mubr.msk.f32.mxu1 %vm6415_vm0, %v8193_v3 }
 0x112   :  { %5872 = vmatprep.subr.bf16.mxu0 %v8217_v56  ;;  %5998 = vmatprep.subr.bf16.mxu1 %v8217_v56 }
 0x113   :  { %5150 = vmatmul.mubr.f32.gmra.mrb[14].mxu0 %v7202_v32  ;;  %5612 = vmatmul.mubr.f32.gmra.mrb[14].mxu1 %v7202_v32  ;;  %v1582_v32 = vsub.f32 %v7659_v36, %v7689_v63 }
 0x114   :  { %5152 = vmatprep.mubr.msk.f32.mxu0 %vm6415_vm0, %v8193_v3  ;;  %5874 = vmatpush3.bf16.msk.msra.mxu0 %vm7684_vm3, %v8218_v37 }
 0x115   :  { %5614 = vmatprep.mubr.msk.f32.mxu1 %vm6415_vm0, %v8193_v3  ;;  %6000 = vmatpush3.bf16.msk.msra.mxu1 %vm7702_vm4, %v8218_v37  ;;  %v1583_v62 = vand.u32 4294901760, %v1582_v32  ;;  %v1648_v32 = vand.u32 4294901760, %v1647_v4  ;;  %v8242_v4 = vand.u32 4294901760, %v7504_v35 }
 0x116   :  { %5170 = vmatprep.subr.mxu0 %v8193_v3  ;;  %5632 = vmatprep.subr.mxu1 %v8193_v3 }
 0x117   :  { %5153 = vmatmul.mubr.f32.gmra.mrb[16].mxu0 %v7242_v30  ;;  %5615 = vmatmul.mubr.f32.gmra.mrb[16].mxu1 %v7242_v30  ;;  %v3763_v30 = vsub.f32 %v7434_v50, %v3762_v40  ;;  %v4476_v40 = vsel %vm3608_vm8, 1.0, %v8193_v3  ;;  %v3777_v6 = vsub.f32 %v7504_v35, %v8242_v4 }
 0x118   :  { %5155 = vmatprep.mubr.msk.f32.mxu0 %vm6415_vm0, %v8193_v3  ;;  %5617 = vmatprep.mubr.msk.f32.mxu1 %vm6415_vm0, %v8193_v3  ;;  %v7810_v44 = vsub.f32 %v4476_v40, %v4476_v40  ;;  %v5879_v40 = vpack.c.bf16 %v1655_v19, %v1648_v32  ;;  %v1603_v19 = vand.u32 4294901760, %v1602_v8  ;;  %v5888_v8 = vpack.c.bf16 %v7432_v43, %v7430_v29  ;;  %v8247_v29 = vld [vmem:[#allocation9_spill] sm:$0xff]  ;;  %v8248_v43 = vld [vmem:[#allocation10_spill] sm:$0xff] }
 0x119   :  { %5171 = vmatpush3.msk.msra.mxu0 %vm1477_vm5, %v8219_v53  ;;  %5633 = vmatpush3.msk.msra.mxu1 %vm3608_vm8, %v8219_v53  ;;  %v3764_v45 = vand.u32 4294901760, %v3763_v30 }
 0x11a   :  { %5875 = vmatprep.subr.bf16.mxu0 %v8217_v56  ;;  %6001 = vmatprep.subr.bf16.mxu1 %v8217_v56  ;;  %v3790_v9 = vand.u32 4294901760, %v7810_v44 }
 0x11b   :  { %5156 = vmatmul.mubr.f32.gmra.mrb[8].mxu0 %v7259_v20  ;;  %5618 = vmatmul.mubr.f32.gmra.mrb[8].mxu1 %v7259_v20  ;;  %v1668_v20 = vsub.f32 %v7492_v25, %v1667_v60  ;;  %v7821_v60 = vand.u32 4294901760, %v7792_v10  ;;  %v6005_v4 = vpack.c.bf16 %v3771_v21, %v3764_v45  ;;  %v1675_v45 = vsub.f32 %v7808_v39, %v1674_v16 }
 0x11c   :  { %5172 = vmatprep.mubr.msk.f32.mxu0 %vm6415_vm0, %v8193_v3  ;;  %5634 = vmatprep.mubr.msk.f32.mxu1 %vm6415_vm0, %v8193_v3  ;;  %v8243_v3 = vand.u32 4294901760, %v7506_v1  ;;  %v3791_v21 = vsub.f32 %v7810_v44, %v3790_v9 }
 0x11d   :  { %v1669_v26 = vand.u32 4294901760, %v1668_v20  ;;  %v1612_v38 = vsub.f32 %v7792_v10, %v7821_v60  ;;  %v1676_v15 = vand.u32 4294901760, %v1675_v45 }
 0x11e   :  { %v3784_v30 = vsub.f32 %v7506_v1, %v8243_v3  ;;  %v3778_v3 = vand.u32 4294901760, %v3777_v6  ;;  %v3792_v20 = vand.u32 4294901760, %v3791_v21 }
 0x11f   :  { %5173 = vmatmul.mubr.f32.vlgmr.msra.gmra.mrb[18].mxu0 %v1583_v62  ;;  %5635 = vmatmul.mubr.f32.vlgmr.msra.gmra.mrb[18].mxu1 %v1583_v62 }
 0x120   :  { %5877 = vmatpush3.bf16.msra.mxu0 %v5876_v34  ;;  %6003 = vmatpush3.bf16.msra.mxu1 %v6002_v23  ;;  %v3785_v62 = vand.u32 4294901760, %v3784_v30  ;;  %v7837_v34 = vand.u32 4294901760, %v7824_v59  ;;  %v5882_v23 = vpack.c.bf16 %v1669_v26, %v1662_v42  ;;  %v1613_v26 = vand.u32 4294901760, %v1612_v38 }
 0x121   :  { %5175 = vmatprep.mubr.msk.f32.mxu0 %vm6415_vm0, %v8244_v54  ;;  %5637 = vmatprep.mubr.msk.f32.mxu1 %vm6415_vm0, %v8244_v54  ;;  %v5885_v30 = vpack.c.bf16 %v7394_v57, %v7392_v52  ;;  %v5891_v52 = vpack.c.bf16 %v7492_v25, %v7490_v24  ;;  %v6017_v57 = vpack.c.bf16 %v7506_v1, %v7504_v35 }
 0x122   :  { %5878 = vmatprep.subr.bf16.mxu0 %v8217_v56  ;;  %6004 = vmatprep.subr.bf16.mxu1 %v8217_v56  ;;  %v6008_v32 = vpack.c.bf16 %v3785_v62, %v3778_v3  ;;  %v1622_v42 = vsub.f32 %v7824_v59, %v7837_v34 }
 0x123   :  { %5176 = vmatmul.mubr.f32.gmra.mrb[20].mxu0 %v1593_v5  ;;  %5638 = vmatmul.mubr.f32.gmra.mrb[20].mxu1 %v1593_v5  ;;  %v6011_v5 = vpack.c.bf16 %v7408_v51, %v7398_v14  ;;  %v8245_v14 = vld [vmem:[#allocation8_spill] sm:$0xff]  ;;  %v8246_v51 = vld [vmem:[#allocation11_spill] sm:$0xff] }
 0x124   :  { %5880 = vmatpush3.bf16.msra.mxu0 %v5879_v40  ;;  %6006 = vmatpush3.bf16.msra.mxu1 %v6005_v4  ;;  %v1623_v6 = vand.u32 4294901760, %v1622_v42  ;;  %v6014_v40 = vpack.c.bf16 %v7438_v41, %v7434_v50 }
 0x125   :  { %5178 = vmatprep.mubr.msk.f32.mxu0 %vm6415_vm0, %v8244_v54  ;;  %5640 = vmatprep.mubr.msk.f32.mxu1 %vm6415_vm0, %v8244_v54 }
 0x126   :  { %5881 = vmatprep.subr.bf16.mxu0 %v8217_v56  ;;  %6007 = vmatprep.subr.bf16.mxu1 %v8217_v56 }
 0x127   :  { %5179 = vmatmul.mubr.f32.gmra.mrb[22].mxu0 %v1603_v19  ;;  %5641 = vmatmul.mubr.f32.gmra.mrb[22].mxu1 %v1603_v19 }
 0x128   :  { %5181 = vmatprep.mubr.msk.f32.mxu0 %vm6415_vm0, %v8244_v54  ;;  %5883 = vmatpush3.bf16.msra.mxu0 %v5882_v23 }
 0x129   :  { %5643 = vmatprep.mubr.msk.f32.mxu1 %vm6415_vm0, %v8244_v54  ;;  %6009 = vmatpush3.bf16.msra.mxu1 %v6008_v32 }
 0x12a   :  { %5199 = vmatprep.subr.mxu0 %v8244_v54  ;;  %5661 = vmatprep.subr.mxu1 %v8244_v54 }
 0x12b   :  { %5182 = vmatmul.mubr.f32.gmra.mrb[24].mxu0 %v1613_v26  ;;  %5644 = vmatmul.mubr.f32.gmra.mrb[24].mxu1 %v1613_v26 }
 0x12c   :  { %5184 = vmatprep.mubr.msk.f32.mxu0 %vm6415_vm0, %v8244_v54  ;;  %5646 = vmatprep.mubr.msk.f32.mxu1 %vm6415_vm0, %v8244_v54 }
 0x12d   :  { %5200 = vmatpush3.msra.mxu0 %v1676_v15  ;;  %5662 = vmatpush3.msra.mxu1 %v3792_v20 }
 0x12e   :  { %5884 = vmatprep.subr.bf16.mxu0 %v8217_v56  ;;  %6010 = vmatprep.subr.bf16.mxu1 %v8217_v56 }
 0x12f   :  { %5185 = vmatmul.mubr.f32.gmra.mrb[8].mxu0 %v1623_v6  ;;  %5647 = vmatmul.mubr.f32.gmra.mrb[8].mxu1 %v1623_v6 }
 0x130   :  { %5201 = vmatprep.mubr.msk.f32.mxu0 %vm6415_vm0, %v8244_v54  ;;  %5663 = vmatprep.mubr.msk.f32.mxu1 %vm6415_vm0, %v8244_v54 }
 0x133   :  { %5202 = vmatmul.mubr.f32.vlgmr.msra.gmra.mrb[18].mxu0 %v7623_v48  ;;  %5664 = vmatmul.mubr.f32.vlgmr.msra.gmra.mrb[18].mxu1 %v7623_v48 }
 0x134   :  { %5886 = vmatpush3.bf16.msra.mxu0 %v5885_v30  ;;  %6012 = vmatpush3.bf16.msra.mxu1 %v6011_v5 }
 0x135   :  { %5204 = vmatprep.mubr.msk.f32.mxu0 %vm6415_vm0, %v8244_v54  ;;  %5666 = vmatprep.mubr.msk.f32.mxu1 %vm6415_vm0, %v8244_v54 }
 0x136   :  { %5887 = vmatprep.subr.bf16.mxu0 %v8217_v56  ;;  %6013 = vmatprep.subr.bf16.mxu1 %v8217_v56 }
 0x137   :  { %5205 = vmatmul.mubr.f32.gmra.mrb[20].mxu0 %v7661_v31  ;;  %5667 = vmatmul.mubr.f32.gmra.mrb[20].mxu1 %v7661_v31 }
 0x138   :  { %5889 = vmatpush3.bf16.msra.mxu0 %v5888_v8  ;;  %6015 = vmatpush3.bf16.msra.mxu1 %v6014_v40 }
 0x139   :  { %5207 = vmatprep.mubr.msk.f32.mxu0 %vm6415_vm0, %v8244_v54  ;;  %5669 = vmatprep.mubr.msk.f32.mxu1 %vm6415_vm0, %v8244_v54 }
 0x13a   :  { %5890 = vmatprep.subr.bf16.mxu0 %v8217_v56  ;;  %6016 = vmatprep.subr.bf16.mxu1 %v8217_v56 }
 0x13b   :  { %5208 = vmatmul.mubr.f32.gmra.mrb[22].mxu0 %v7712_v18  ;;  %5670 = vmatmul.mubr.f32.gmra.mrb[22].mxu1 %v7712_v18 }
 0x13c   :  { %5210 = vmatprep.mubr.msk.f32.mxu0 %vm6415_vm0, %v8244_v54  ;;  %5892 = vmatpush3.bf16.msra.mxu0 %v5891_v52 }
 0x13d   :  { %5672 = vmatprep.mubr.msk.f32.mxu1 %vm6415_vm0, %v8244_v54  ;;  %6018 = vmatpush3.bf16.msra.mxu1 %v6017_v57 }
 0x13e   :  { %5228 = vmatprep.subr.mxu0 %v8244_v54  ;;  %5690 = vmatprep.subr.mxu1 %v8244_v54 }
 0x13f   :  { %5211 = vmatmul.mubr.f32.gmra.mrb[24].mxu0 %v7747_v13  ;;  %5673 = vmatmul.mubr.f32.gmra.mrb[24].mxu1 %v7747_v13 }
 0x140   :  { %5213 = vmatprep.mubr.msk.f32.mxu0 %vm6415_vm0, %v8244_v54  ;;  %5675 = vmatprep.mubr.msk.f32.mxu1 %vm6415_vm0, %v8244_v54 }
 0x141   :  { %5229 = vmatpush3.msra.mxu0 %v7808_v39  ;;  %5691 = vmatpush3.msra.mxu1 %v7810_v44 }
 0x142   :  { %5893 = vmatprep.subr.bf16.mxu0 %v8217_v56  ;;  %6019 = vmatprep.subr.bf16.mxu1 %v8217_v56 }
 0x143   :  { %5214 = vmatmul.mubr.f32.gmra.mrb[8].mxu0 %v7796_v28  ;;  %5676 = vmatmul.mubr.f32.gmra.mrb[8].mxu1 %v7796_v28 }
 0x144   :  { %5230 = vmatprep.mubr.msk.f32.mxu0 %vm6415_vm0, %v8244_v54  ;;  %5692 = vmatprep.mubr.msk.f32.mxu1 %vm6415_vm0, %v8244_v54 }
 0x147   :  { %5231 = vmatmul.mubr.f32.vlgmr.msra.gmra.mrb[18].mxu0 %v7659_v36  ;;  %5693 = vmatmul.mubr.f32.vlgmr.msra.gmra.mrb[18].mxu1 %v7659_v36 }
 0x148   :  { %5895 = vmatpush3.bf16.msk.msra.mxu0 %vm7609_vm7, %v8218_v37  ;;  %6021 = vmatpush3.bf16.msk.msra.mxu1 %vm7619_vm11, %v8218_v37 }
 0x149   :  { %5233 = vmatprep.mubr.msk.f32.mxu0 %vm6415_vm0, %v8244_v54  ;;  %5695 = vmatprep.mubr.msk.f32.mxu1 %vm6415_vm0, %v8244_v54 }
 0x14a   :  { %5896 = vmatprep.subr.bf16.mxu0 %v8217_v56  ;;  %6022 = vmatprep.subr.bf16.mxu1 %v8217_v56 }
 0x14b   :  { %5234 = vmatmul.mubr.f32.gmra.mrb[20].mxu0 %v7692_v47  ;;  %5696 = vmatmul.mubr.f32.gmra.mrb[20].mxu1 %v7692_v47 }
 0x14c   :  { %5898 = vmatpush3.bf16.msk.msra.mxu0 %vm7640_vm13, %v8218_v37  ;;  %6024 = vmatpush3.bf16.msk.msra.mxu1 %vm7654_vm2, %v8218_v37 }
 0x14d   :  { %5236 = vmatprep.mubr.msk.f32.mxu0 %vm6415_vm0, %v8244_v54  ;;  %5698 = vmatprep.mubr.msk.f32.mxu1 %vm6415_vm0, %v8244_v54 }
 0x14e   :  { %5899 = vmatprep.subr.bf16.mxu0 %v8217_v56  ;;  %6025 = vmatprep.subr.bf16.mxu1 %v8217_v56 }
 0x14f   :  { %5237 = vmatmul.mubr.f32.gmra.mrb[22].mxu0 %v7745_v7  ;;  %5699 = vmatmul.mubr.f32.gmra.mrb[22].mxu1 %v7745_v7 }
 0x150   :  { %5239 = vmatprep.mubr.msk.f32.mxu0 %vm6415_vm0, %v8244_v54  ;;  %5901 = vmatpush3.bf16.msk.msra.mxu0 %vm7684_vm3, %v8218_v37 }
 0x151   :  { %5701 = vmatprep.mubr.msk.f32.mxu1 %vm6415_vm0, %v8244_v54  ;;  %6027 = vmatpush3.bf16.msk.msra.mxu1 %vm7702_vm4, %v8218_v37 }
 0x152   :  { %5257 = vmatprep.subr.mxu0 %v8244_v54  ;;  %5719 = vmatprep.subr.mxu1 %v8244_v54 }
 0x153   :  { %5240 = vmatmul.mubr.f32.gmra.mrb[24].mxu0 %v7792_v10  ;;  %5702 = vmatmul.mubr.f32.gmra.mrb[24].mxu1 %v7792_v10 }
 0x154   :  { %5242 = vmatprep.mubr.msk.f32.mxu0 %vm6415_vm0, %v8244_v54  ;;  %5704 = vmatprep.mubr.msk.f32.mxu1 %vm6415_vm0, %v8244_v54 }
 0x155   :  { %5258 = vmatpush3.msk.msra.mxu0 %vm1477_vm5, %v8219_v53  ;;  %5720 = vmatpush3.msk.msra.mxu1 %vm3608_vm8, %v8219_v53 }
 0x156   :  { %5902 = vmatprep.subr.bf16.mxu0 %v8217_v56  ;;  %6028 = vmatprep.subr.bf16.mxu1 %v8217_v56 }
 0x157   :  { %5243 = vmatmul.mubr.f32.gmra.mrb[8].mxu0 %v7824_v59  ;;  %5705 = vmatmul.mubr.f32.gmra.mrb[8].mxu1 %v7824_v59 }
 0x158   :  { %5259 = vmatprep.mubr.msk.f32.mxu0 %vm6415_vm0, %v8244_v54  ;;  %5721 = vmatprep.mubr.msk.f32.mxu1 %vm6415_vm0, %v8244_v54 }
 0x15b   :  { %5260 = vmatmul.mubr.f32.vlgmr.msra.gmra.mrb[18].mxu0 %v7689_v63  ;;  %5722 = vmatmul.mubr.f32.vlgmr.msra.gmra.mrb[18].mxu1 %v7689_v63 }
 0x15c   :  { %5904 = vmatpush3.bf16.msra.mxu0 %v7456_v0  ;;  %6030 = vmatpush3.bf16.msra.mxu1 %v7474_v17 }
 0x15d   :  { %5262 = vmatprep.mubr.msk.f32.mxu0 %vm6415_vm0, %v8244_v54  ;;  %5724 = vmatprep.mubr.msk.f32.mxu1 %vm6415_vm0, %v8244_v54 }
 0x15e   :  { %5905 = vmatprep.subr.bf16.mxu0 %v8217_v56  ;;  %6031 = vmatprep.subr.bf16.mxu1 %v8217_v56 }
 0x15f   :  { %5263 = vmatmul.mubr.f32.gmra.mrb[20].mxu0 %v7740_v11  ;;  %5725 = vmatmul.mubr.f32.gmra.mrb[20].mxu1 %v7740_v11 }
 0x160   :  { %5907 = vmatpush3.bf16.msra.mxu0 %v7498_v46  ;;  %6033 = vmatpush3.bf16.msra.mxu1 %v8245_v14 }
 0x161   :  { %5265 = vmatprep.mubr.msk.f32.mxu0 %vm6415_vm0, %v8244_v54  ;;  %5727 = vmatprep.mubr.msk.f32.mxu1 %vm6415_vm0, %v8244_v54 }
 0x162   :  { %5908 = vmatprep.subr.bf16.mxu0 %v8217_v56  ;;  %6034 = vmatprep.subr.bf16.mxu1 %v8217_v56 }
 0x163   :  { %5266 = vmatmul.mubr.f32.gmra.mrb[22].mxu0 %v8246_v51  ;;  %5728 = vmatmul.mubr.f32.gmra.mrb[22].mxu1 %v8246_v51 }
 0x164   :  { %5268 = vmatprep.mubr.msk.f32.mxu0 %vm6415_vm0, %v8244_v54  ;;  %5910 = vmatpush3.bf16.msra.mxu0 %v8247_v29 }
 0x165   :  { %5730 = vmatprep.mubr.msk.f32.mxu1 %vm6415_vm0, %v8244_v54  ;;  %6036 = vmatpush3.bf16.msra.mxu1 %v8248_v43 }
 0x166   :  { %v8013_v50 = vpop.f32.mrb[0].mxu0  ;;  %v8015_v41 = vpop.f32.mrb[0].mxu1  ;;  %5286 = vmatprep.subr.mxu0 %v8244_v54  ;;  %5748 = vmatprep.subr.mxu1 %v8244_v54 }
 0x167   :  { %v5031_v0 = vpop.f32.mrb[1].mxu0  ;;  %5269 = vmatmul.mubr.f32.gmra.mrb[24].mxu0 %v7821_v60  ;;  %v5493_v17 = vpop.f32.mrb[1].mxu1  ;;  %5731 = vmatmul.mubr.f32.gmra.mrb[24].mxu1 %v7821_v60 }
 0x168   :  { %5271 = vmatprep.mubr.msk.f32.mxu0 %vm6415_vm0, %v8244_v54  ;;  %5733 = vmatprep.mubr.msk.f32.mxu1 %vm6415_vm0, %v8244_v54 }
 0x169   :  { %5287 = vmatpush3.msra.mxu0 %v1674_v16  ;;  %5749 = vmatpush3.msra.mxu1 %v3790_v9 }
 0x16a   :  { %v8029_v24 = vpop.f32.mrb[2].mxu0  ;;  %v8031_v25 = vpop.f32.mrb[2].mxu1  ;;  %5911 = vmatprep.subr.bf16.mxu0 %v8217_v56  ;;  %6037 = vmatprep.subr.bf16.mxu1 %v8217_v56 }
 0x16b   :  { %v5034_v46 = vpop.f32.mrb[3].mxu0  ;;  %5272 = vmatmul.mubr.f32.gmra.mrb[8].mxu0 %v7837_v34  ;;  %v5496_v35 = vpop.f32.mrb[3].mxu1  ;;  %5734 = vmatmul.mubr.f32.gmra.mrb[8].mxu1 %v7837_v34 }
 0x16c   :  { %5288 = vmatprep.mubr.msk.f32.mxu0 %vm6415_vm0, %v8244_v54  ;;  %5750 = vmatprep.mubr.msk.f32.mxu1 %vm6415_vm0, %v8244_v54 }
 0x16e   :  { %v8041_v1 = vpop.f32.mrb[4].mxu0  ;;  %v8043_v36 = vpop.f32.mrb[4].mxu1 }
 0x16f   :  { %v5037_v63 = vpop.f32.mrb[5].mxu0  ;;  %5289 = vmatmul.mubr.f32.vlgmr.msra.gmra.mrb[18].mxu0 %v7623_v48  ;;  %v5499_v47 = vpop.f32.mrb[5].mxu1  ;;  %5751 = vmatmul.mubr.f32.vlgmr.msra.gmra.mrb[18].mxu1 %v7623_v48 }
 0x170   :  { %5913 = vmatpush3.bf16.msk.msra.mxu0 %vm7609_vm7, %v8218_v37  ;;  %6039 = vmatpush3.bf16.msk.msra.mxu1 %vm7619_vm11, %v8218_v37 }
 0x171   :  { %5291 = vmatprep.mubr.msk.f32.mxu0 %vm6415_vm0, %v8244_v54  ;;  %5753 = vmatprep.mubr.msk.f32.mxu1 %vm6415_vm0, %v8244_v54 }
 0x172   :  { %v8057_v11 = vpop.f32.mrb[6].mxu0  ;;  %v8059_v7 = vpop.f32.mrb[6].mxu1  ;;  %5914 = vmatprep.subr.bf16.mxu0 %v8217_v56  ;;  %6040 = vmatprep.subr.bf16.mxu1 %v8217_v56 }
 0x173   :  { %v5040_v49 = vpop.f32.mrb[7].mxu0  ;;  %5292 = vmatmul.mubr.f32.gmra.mrb[20].mxu0 %v7661_v31  ;;  %v5502_v9 = vpop.f32.mrb[7].mxu1  ;;  %5754 = vmatmul.mubr.f32.gmra.mrb[20].mxu1 %v7661_v31 }
 0x174   :  { %5916 = vmatpush3.bf16.msk.msra.mxu0 %vm7640_vm13, %v8218_v37  ;;  %6042 = vmatpush3.bf16.msk.msra.mxu1 %vm7654_vm2, %v8218_v37 }
 0x175   :  { %5294 = vmatprep.mubr.msk.f32.mxu0 %vm6415_vm0, %v8244_v54  ;;  %5756 = vmatprep.mubr.msk.f32.mxu1 %vm6415_vm0, %v8244_v54 }
 0x176   :  { %5917 = vmatprep.subr.bf16.mxu0 %v8217_v56  ;;  %6043 = vmatprep.subr.bf16.mxu1 %v8217_v56 }
 0x177   :  { %5295 = vmatmul.mubr.f32.gmra.mrb[22].mxu0 %v7712_v18  ;;  %5757 = vmatmul.mubr.f32.gmra.mrb[22].mxu1 %v7712_v18 }
 0x178   :  { %5297 = vmatprep.mubr.msk.f32.mxu0 %vm6415_vm0, %v8244_v54  ;;  %5919 = vmatpush3.bf16.msk.msra.mxu0 %vm7684_vm3, %v8218_v37 }
 0x179   :  { %5759 = vmatprep.mubr.msk.f32.mxu1 %vm6415_vm0, %v8244_v54  ;;  %6045 = vmatpush3.bf16.msk.msra.mxu1 %vm7702_vm4, %v8218_v37 }
 0x17a   :  { %5315 = vmatprep.subr.mxu0 %v8244_v54  ;;  %5777 = vmatprep.subr.mxu1 %v8244_v54 }
 0x17b   :  { %5298 = vmatmul.mubr.f32.gmra.mrb[24].mxu0 %v7747_v13  ;;  %5760 = vmatmul.mubr.f32.gmra.mrb[24].mxu1 %v7747_v13 }
 0x17c   :  { %5300 = vmatprep.mubr.msk.f32.mxu0 %vm6415_vm0, %v8244_v54  ;;  %5762 = vmatprep.mubr.msk.f32.mxu1 %vm6415_vm0, %v8244_v54 }
 0x17d   :  { %5316 = vmatpush3.msk.msra.mxu0 %vm1477_vm5, %v8219_v53  ;;  %5778 = vmatpush3.msk.msra.mxu1 %vm3608_vm8, %v8219_v53 }
 0x17f   :  { %5301 = vmatmul.mubr.f32.gmra.mrb[8].mxu0 %v7796_v28  ;;  %5763 = vmatmul.mubr.f32.gmra.mrb[8].mxu1 %v7796_v28 }
 0x180   :  { %5317 = vmatprep.mubr.msk.f32.mxu0 %vm6415_vm0, %v8244_v54  ;;  %5779 = vmatprep.mubr.msk.f32.mxu1 %vm6415_vm0, %v8244_v54 }
 0x183   :  { %5318 = vmatmul.mubr.f32.vlgmr.msra.gmra.mrb[18].mxu0 %v7623_v48  ;;  %5780 = vmatmul.mubr.f32.vlgmr.msra.gmra.mrb[18].mxu1 %v7623_v48 }
 0x184   :  { %5320 = vmatprep.mubr.msk.f32.mxu0 %vm6415_vm0, %v8244_v54  ;;  %5782 = vmatprep.mubr.msk.f32.mxu1 %vm6415_vm0, %v8244_v54 }
 0x187   :  { %5321 = vmatmul.mubr.f32.gmra.mrb[20].mxu0 %v7661_v31  ;;  %5783 = vmatmul.mubr.f32.gmra.mrb[20].mxu1 %v7661_v31 }
 0x188   :  { %5323 = vmatprep.mubr.msk.f32.mxu0 %vm6415_vm0, %v8244_v54  ;;  %5785 = vmatprep.mubr.msk.f32.mxu1 %vm6415_vm0, %v8244_v54 }
 0x18b   :  { %5324 = vmatmul.mubr.f32.gmra.mrb[22].mxu0 %v7712_v18  ;;  %5786 = vmatmul.mubr.f32.gmra.mrb[22].mxu1 %v7712_v18 }
 0x18c   :  { %5326 = vmatprep.mubr.msk.f32.mxu0 %vm6415_vm0, %v8244_v54  ;;  %5788 = vmatprep.mubr.msk.f32.mxu1 %vm6415_vm0, %v8244_v54 }
 0x18f   :  { %5327 = vmatmul.mubr.f32.gmra.mrb[24].mxu0 %v7747_v13  ;;  %5789 = vmatmul.mubr.f32.gmra.mrb[24].mxu1 %v7747_v13 }
 0x190   :  { %5329 = vmatprep.mubr.msk.f32.mxu0 %vm6415_vm0, %v8244_v54  ;;  %5791 = vmatprep.mubr.msk.f32.mxu1 %vm6415_vm0, %v8244_v54 }
 0x193   :  { %5330 = vmatmul.mubr.f32.gmra.mrb[8].mxu0 %v7796_v28  ;;  %5792 = vmatmul.mubr.f32.gmra.mrb[8].mxu1 %v7796_v28 }
 0x1de   :  { %v1438_v22 = vpop.f32.mrb[10].mxu0  ;;  %v3569_v56 = vpop.f32.mrb[10].mxu1 }
 0x1df   :  { %v5145_v37 = vpop.f32.mrb[11].mxu0  ;;  %v5607_v53 = vpop.f32.mrb[11].mxu1 }
 0x1e2   :  { %v1444_v55 = vpop.f32.mrb[12].mxu0  ;;  %v3575_v58 = vpop.f32.mrb[12].mxu1 }
 0x1e3   :  { %v5148_v12 = vpop.f32.mrb[13].mxu0  ;;  %v5610_v48 = vpop.f32.mrb[13].mxu1 }
 0x1e6   :  { %v1450_v2 = vpop.f32.mrb[14].mxu0  ;;  %v3581_v27 = vpop.f32.mrb[14].mxu1 }
 0x1e7   :  { %v5151_v31 = vpop.f32.mrb[15].mxu0  ;;  %v5613_v61 = vpop.f32.mrb[15].mxu1 }
 0x1ea   :  { %v1456_v33 = vpop.f32.mrb[16].mxu0  ;;  %v3587_v18 = vpop.f32.mrb[16].mxu1 }
 0x1eb   :  { %v5154_v13 = vpop.f32.mrb[17].mxu0  ;;  %v5616_v54 = vpop.f32.mrb[17].mxu1 }
 0x256   :  { %v2175_v10 = vpop.f32.mrb[18].mxu0  ;;  %v4291_v39 = vpop.f32.mrb[18].mxu1 }
 0x257   :  { %v2205_v28 = vmul.f32 %v2175_v10, %v8013_v50  ;;  %v2209_v44 = vsub.f32 %v2175_v10, %v8013_v50  ;;  %v4321_v60 = vmul.f32 %v4291_v39, %v8015_v41  ;;  %v4325_v59 = vsub.f32 %v4291_v39, %v8015_v41  ;;  %v5319_v4 = vpop.f32.mrb[19].mxu0  ;;  %v5781_v3 = vpop.f32.mrb[19].mxu1 }
 0x259   :  { %v2213_v62 = vmul.f32 %v2209_v44, %v1438_v22  ;;  %v4329_v16 = vmul.f32 %v4325_v59, %v3569_v56 }
 0x25a   :  { %v2181_v19 = vpop.f32.mrb[20].mxu0  ;;  %v4297_v38 = vpop.f32.mrb[20].mxu1 }
 0x25b   :  { %v2217_v34 = vadd.f32 %v2213_v62, %v2205_v28  ;;  %v4333_v23 = vadd.f32 %v4329_v16, %v4321_v60  ;;  %v2206_v32 = vmul.f32 %v2181_v19, %v8029_v24  ;;  %v2210_v45 = vsub.f32 %v2181_v19, %v8029_v24  ;;  %v5322_v21 = vpop.f32.mrb[21].mxu0  ;;  %v5784_v26 = vpop.f32.mrb[21].mxu1 }
 0x25c   :  { %v4322_v42 = vmul.f32 %v4297_v38, %v8031_v25  ;;  %v4326_v15 = vsub.f32 %v4297_v38, %v8031_v25 }
 0x25d   :  { %v2214_v20 = vmul.f32 %v2210_v45, %v1444_v55 }
 0x25e   :  { %v4330_v6 = vmul.f32 %v4326_v15, %v3575_v58  ;;  %v2187_v30 = vpop.f32.mrb[22].mxu0  ;;  %v4303_v5 = vpop.f32.mrb[22].mxu1 }
 0x25f   :  { %v2218_v8 = vadd.f32 %v2214_v20, %v2206_v32  ;;  %v2207_v40 = vmul.f32 %v2187_v30, %v8041_v1  ;;  %v2211_v52 = vsub.f32 %v2187_v30, %v8041_v1  ;;  %v4323_v57 = vmul.f32 %v4303_v5, %v8043_v36  ;;  %v5325_v14 = vpop.f32.mrb[23].mxu0  ;;  %v5787_v51 = vpop.f32.mrb[23].mxu1 }
 0x260   :  { %v4334_v29 = vadd.f32 %v4330_v6, %v4322_v42  ;;  %v4327_v43 = vsub.f32 %v4303_v5, %v8043_v36 }
 0x261   :  { %v2221_v50 = vadd.f32 %v2218_v8, %v2217_v34  ;;  %v2215_v41 = vmul.f32 %v2211_v52, %v1450_v2 }
 0x262   :  { %v4337_v0 = vadd.f32 %v4334_v29, %v4333_v23  ;;  %v4331_v17 = vmul.f32 %v4327_v43, %v3581_v27  ;;  %v2193_v24 = vpop.f32.mrb[24].mxu0  ;;  %v4309_v25 = vpop.f32.mrb[24].mxu1 }
 0x263   :  { %v2219_v46 = vadd.f32 %v2215_v41, %v2207_v40  ;;  %v2208_v35 = vmul.f32 %v2193_v24, %v8057_v11  ;;  %v2212_v63 = vsub.f32 %v2193_v24, %v8057_v11  ;;  %v4324_v1 = vmul.f32 %v4309_v25, %v8059_v7  ;;  %v5328_v47 = vpop.f32.mrb[25].mxu0  ;;  %v5790_v49 = vpop.f32.mrb[25].mxu1 }
 0x264   :  { %v4335_v9 = vadd.f32 %v4331_v17, %v4323_v57  ;;  %v4328_v22 = vsub.f32 %v4309_v25, %v8059_v7 }
 0x265   :  { %v2222_v56 = vadd.f32 %v2221_v50, %v2219_v46  ;;  %v2216_v36 = vmul.f32 %v2212_v63, %v1456_v33 }
 0x266   :  { %v4338_v37 = vadd.f32 %v4337_v0, %v4335_v9  ;;  %v4332_v53 = vmul.f32 %v4328_v22, %v3587_v18  ;;  %v2199_v55 = vpop.f32.mrb[8].mxu0  ;;  %v4315_v58 = vpop.f32.mrb[8].mxu1 }
 0x267   :  { %v2220_v12 = vadd.f32 %v2216_v36, %v2208_v35  ;;  %v5331_v48 = vpop.f32.mrb[9].mxu0  ;;  %v5793_v2 = vpop.f32.mrb[9].mxu1 }
 0x268   :  { %v4336_v27 = vadd.f32 %v4332_v53, %v4324_v1 }
 0x269   :  { %v2223_v31 = vadd.f32 %v2222_v56, %v2220_v12 }
 0x26a   :  { %v4339_v61 = vadd.f32 %v4338_v37, %v4336_v27 }
 0x26b   :  { %v2224_v11 = vrot.slane %v2223_v31, 4 }
 0x26c   :  { %v4340_v13 = vrot.slane %v4339_v61, 4 }
 0x26d   :  { %v2225_v54 = vadd.f32 %v2224_v11, %v2223_v31 }
 0x26e   :  { %v4341_v10 = vadd.f32 %v4340_v13, %v4339_v61 }
 0x26f   :  { %v2226_v39 = vrot.slane %v2225_v54, 2 }
 0x270   :  { %v4342_v28 = vrot.slane %v4341_v10, 2 }
 0x271   :  { %v2227_v44 = vadd.f32 %v2226_v39, %v2225_v54 }
 0x272   :  { %v4343_v7 = vadd.f32 %v4342_v28, %v4341_v10 }
 0x273   :  { %v2228_v60 = vrot.slane %v2227_v44, 1 }
 0x274   :  { %v4344_v33 = vrot.slane %v4343_v7, 1 }
 0x275   :  { %v2229_v59 = vadd.f32 %v2228_v60, %v2227_v44 }
 0x276   :  { %v4345_v18 = vadd.f32 %v4344_v33, %v4343_v7 }
 0x277   :  { %v2230_v4 = vmul.f32 2.0, %v2229_v59 }
 0x278   :  { %v4346_v3 = vmul.f32 2.0, %v4345_v18 }
 0x279   :  { %v2231_v62 = vsub.f32 %v2199_v55, %v2230_v4 }
 0x27a   :  { %v4347_v16 = vsub.f32 %v4315_v58, %v4346_v3 }
 0x27b   :  { %2232 = vst [vmem:[#allocation5] sm:$0x1] %v2231_v62 }
 0x27c   :  { %4348 = vst [vmem:[#allocation5 + $0x1] sm:$0x1] %v4347_v16 }
 0x27d   :  { %6396 = shalt.err (!%p6393_p12)
}
 0x27e   :  { %s6397_s27 = scalar_lea.hbm %s8174_s9, 32 }
 0x27f   :  { %p6398_p13 = scmp.ne.s32.totalorder %s8174_s9, %s6397_s27  ;;  %p6401_p0 = scmp.lt.u32.totalorder %s6397_s27, %s8174_s9 }
 0x281   :  { %p6403_p1 = pnand %p6401_p0, %p6398_p13 }
 0x283   :  { %6406 = shalt.err (!%p6403_p1)
}
 0x284   :  { %4358 = dma.vmem_to_hbm [thread:$0]  %s4356_s8, 32, %s8174_s9, [#allocation4]  }
 0x285   :  { %6409 = dma.done.wait [#allocation4], 32  }
 0x286   :  { %6410 = vsyncadd [#allocation4], 4294967264 }
 0x287   :  { %4362 = vsyncpa [#allocation3], 1 }
 0x288   :  { %4363 = vsyncpa [#allocation4], 1 }

</bundles_post_ra>
